<compile_context>
chip_gen: v7x
topology: tpu7x:2x2x1
jax: 0.10.0
libtpu: 0.0.40
codegen_flags: <defaults>
</compile_context>

<pallas_src>
import numpy as np
import jax
import jax.numpy as jnp
from jax.experimental import pallas as pl
from jax.experimental.pallas import tpu as pltpu

EPS = 1e-5  # PyTorch InstanceNorm3d default eps (affine=False, biased variance)


# --------------------------------------------------------------------------- #
#  Pallas kernel: one grid step = (one group, one batch tile).
#  Ref shapes (group dim squeezed by the BlockSpecs):
#    x_ref / out_ref : (Nt, Cg, S)
#    caw1 (Cg, Crg)  cab1 (1, Crg)  caw2 (Crg, Cg)  cab2 (1, Cg)
#    spw1 (Ch2g, Cg) spb1 (Ch2g, 1) spmt (Ch2g, S, S) bf16  spb2 (1, 1)
# --------------------------------------------------------------------------- #
def sc_attention_kernel(x_ref, caw1_ref, cab1_ref, caw2_ref, cab2_ref,
                        spw1_ref, spb1_ref, spmt_ref, spb2_ref, out_ref):
    xg = x_ref[...]                                   # (Nt, Cg, S) f32
    nt, cg, s = xg.shape
    ch2g = spw1_ref.shape[0]
    crg = caw2_ref.shape[0]

    # ---- channel attention: global max+avg pool, two grouped 1x1x1 convs ----
    pooled = jnp.max(xg, axis=-1) + jnp.mean(xg, axis=-1)          # (Nt, Cg)
    # first projection on the VPU (K=Cg, N=Crg are tiny; avoid an MXU round trip)
    w1 = caw1_ref[...]                                             # (Cg, Crg)
    h1 = cab1_ref[...]                                             # (1, Crg)
    for c in range(cg):
        h1 = h1 + pooled[:, c:c + 1] * w1[c:c + 1, :]              # (Nt, Crg)
    h1 = jnp.tanh(h1)
    # second projection as an unrolled outer-product accumulation (Crg is tiny)
    w2 = caw2_ref[...]                                             # (Crg, Cg)
    h2 = cab2_ref[...]                                             # (1, Cg)
    for r in range(crg):
        h2 = h2 + h1[:, r:r + 1] * w2[r:r + 1, :]                  # (Nt, Cg)
    ch_att = jax.nn.sigmoid(h2)                                    # (Nt, Cg)
    x1 = xg * ch_att[:, :, None]                                   # (Nt, Cg, S)

    # ---- spatial attention ----
    # grouped 1x1x1 conv: unrolled Cg-term FMA chain (no big broadcast temp)
    spw1 = spw1_ref[...]                                           # (Ch2g, Cg)
    u = spb1_ref[...][None, :, :]                                  # (1, Ch2g, 1)
    for c in range(cg):
        u = u + spw1[:, c][None, :, None] * x1[:, c:c + 1, :]      # (Nt, Ch2g, S)

    # InstanceNorm3d (no affine, biased var, two-pass stats) + Tanh
    mu = jnp.mean(u, axis=-1, keepdims=True)
    du = u - mu
    var = jnp.mean(du * du, axis=-1, keepdims=True)
    t = jnp.tanh(du * jax.lax.rsqrt(var + EPS))                    # (Nt, Ch2g, S)

    # grouped 7x7x7 'same' conv: Ch2g accumulating bf16 MXU dots, f32 accum.
    acc = jnp.zeros((nt, s), jnp.float32)
    for h in range(ch2g):
        acc = acc + jnp.dot(t[:, h, :].astype(jnp.bfloat16), spmt_ref[h],
                            preferred_element_type=jnp.float32)    # (Nt, S)
    v = acc + spb2_ref[...]                                        # (Nt, S)

    # InstanceNorm over the single per-group channel + sigmoid
    mu2 = jnp.mean(v, axis=-1, keepdims=True)
    dv = v - mu2
    var2 = jnp.mean(dv * dv, axis=-1, keepdims=True)
    s_att = jax.nn.sigmoid(dv * jax.lax.rsqrt(var2 + EPS))         # (Nt, S)

    # residual: x + (x * ch_att) * spatial_att  (spatial map broadcast over Cg)
    out_ref[...] = (xg + x1 * s_att[:, None, :]).astype(out_ref.dtype)


# --------------------------------------------------------------------------- #
#  Parameter setup (plain numpy / JAX glue)
# --------------------------------------------------------------------------- #
def conv7_toeplitz(w7, Z, Y, X, pad=3):
    """w7: (G, Cin_g, 7, 7, 7) -> MT: (G, Cin_g, S, S) with out = sum_c t[c] @ MT[g, c]."""
    G, cin_g, KZ, KY, KX = w7.shape
    S = Z * Y * X
    mt = np.zeros((G, cin_g, S, S), dtype=np.float32)
    oz_all, oy_all, ox_all = np.arange(Z), np.arange(Y), np.arange(X)
    for g in range(G):
        for c in range(cin_g):
            for kz in range(KZ):
                iz = oz_all + kz - pad
                vz = (iz >= 0) & (iz < Z)
                for ky in range(KY):
                    iy = oy_all + ky - pad
                    vy = (iy >= 0) & (iy < Y)
                    for kx in range(KX):
                        ix = ox_all + kx - pad
                        vx = (ix >= 0) & (ix < X)
                        w = w7[g, c, kz, ky, kx]
                        OZ, OY, OX = np.meshgrid(oz_all[vz], oy_all[vy], ox_all[vx],
                                                 indexing="ij")
                        IZ, IY, IX = np.meshgrid(iz[vz], iy[vy], ix[vx], indexing="ij")
                        so = (OZ * Y + OY) * X + OX
                        si = (IZ * Y + IY) * X + IX
                        mt[g, c, si.ravel(), so.ravel()] += w
    return mt


def build_kernel_params(tw, groups, Z, Y, X):
    """Derive kernel-layout params from PyTorch-layout weights."""
    C = tw["W_ca2"].shape[0]
    cg = C // groups
    cr = tw["W_ca1"].shape[0]
    crg = cr // groups
    ch2 = tw["W_sp1"].shape[0]
    ch2g = ch2 // groups

    w_ca1 = np.asarray(tw["W_ca1"])[:, :, 0, 0, 0]            # (Cr, Cg)
    w_ca2 = np.asarray(tw["W_ca2"])[:, :, 0, 0, 0]            # (C, Crg)
    w_sp1 = np.asarray(tw["W_sp1"])[:, :, 0, 0, 0]            # (Ch2, Cg)

    mt = conv7_toeplitz(np.asarray(tw["W_sp2"]), Z, Y, X)     # (G, Ch2g, S, S)

    return dict(
        caw1=jnp.asarray(w_ca1.reshape(groups, crg, cg).transpose(0, 2, 1)),  # (G, Cg, Crg)
        cab1=jnp.asarray(np.asarray(tw["b_ca1"]).reshape(groups, 1, crg)),    # (G, 1, Crg)
        caw2=jnp.asarray(w_ca2.reshape(groups, cg, crg).transpose(0, 2, 1)),  # (G, Crg, Cg)
        cab2=jnp.asarray(np.asarray(tw["b_ca2"]).reshape(groups, 1, cg)),     # (G, 1, Cg)
        spw1=jnp.asarray(w_sp1.reshape(groups, ch2g, cg)),                    # (G, Ch2g, Cg)
        spb1=jnp.asarray(np.asarray(tw["b_sp1"]).reshape(groups, ch2g, 1)),   # (G, Ch2g, 1)
        spmt=jnp.asarray(mt, dtype=jnp.bfloat16),                             # (G, Ch2g, S, S)
        spb2=jnp.asarray(np.asarray(tw["b_sp2"]).reshape(groups, 1, 1)),      # (G, 1, 1)
    )


# --------------------------------------------------------------------------- #
#  Wrapper around pallas_call
# --------------------------------------------------------------------------- #
def _pick_n_tile(N, groups):
    """Largest divisor of N <= 128 (prefer multiples of 8 for MXU M / sublanes);
    if groups == 1, keep >= 2 grid steps so v7x can use both TensorCores."""
    cap = 128
    if groups == 1 and N > 1:
        cap = min(cap, N // 2)
    divs = [t for t in range(1, min(N, cap) + 1) if N % t == 0]
    mult8 = [t for t in divs if t % 8 == 0]
    return max(mult8) if mult8 else max(divs)


def sc_attention_pallas(x5, p, groups, n_tile=None):
    N, C, Z, Y, X = x5.shape
    S = Z * Y * X
    cg = C // groups
    ch2g = p["spmt"].shape[1]
    if n_tile is None:
        n_tile = _pick_n_tile(N, groups)
    assert N % n_tile == 0

    # (N, C, Z, Y, X) -> (N, G, Cg, S): contiguous reshape, NO HBM transpose.
    x = x5.reshape(N, groups, cg, S)

    def wspec(arr):
        zeros = (0,) * (arr.ndim - 1)
        return pl.BlockSpec((None,) + tuple(arr.shape[1:]),
                            lambda g, n, _z=zeros: (g,) + _z)

    xo_spec = lambda: pl.BlockSpec((n_tile, None, cg, S), lambda g, n: (n, g, 0, 0))

    # VMEM budget derived from actual tile sizes, clamped to ~7/8 of physical.
    try:
        vmem_cap = int(getattr(pltpu.get_tpu_info(), "vmem_capacity_bytes",
                               64 * 1024 * 1024))
    except Exception:
        vmem_cap = 64 * 1024 * 1024
    xblk = n_tile * max(cg, 8) * S * 4                 # f32, sublane-padded
    need = 2 * 2 * xblk                                # x + out, double-buffered
    need += 2 * ch2g * S * S * 2                       # bf16 Toeplitz slab, double-buffered
    need += 6 * xblk                                   # in-kernel f32 intermediates
    need += 16 * 1024 * 1024                           # headroom (relayouts, small weights)
    vmem_limit = int(min(max(need, 32 * 1024 * 1024), int(0.875 * vmem_cap)))

    cost = pl.CostEstimate(
        flops=int(2 * N * groups * ch2g * S * S + 6 * N * C * S),
        transcendentals=int(N * groups * ch2g * S + N * groups * S + 4 * N * C),
        bytes_accessed=int(2 * x5.size * x5.dtype.itemsize + p["spmt"].size * 2),
    )

    out = pl.pallas_call(
        sc_attention_kernel,
        out_shape=jax.ShapeDtypeStruct((N, groups, cg, S), x5.dtype),
        grid_spec=pltpu.PrefetchScalarGridSpec(
            num_scalar_prefetch=0,
            grid=(groups, N // n_tile),          # group outer: weights stay resident
            in_specs=[
                xo_spec(),
                wspec(p["caw1"]), wspec(p["cab1"]),
                wspec(p["caw2"]), wspec(p["cab2"]),
                wspec(p["spw1"]), wspec(p["spb1"]),
                wspec(p["spmt"]), wspec(p["spb2"]),
            ],
            out_specs=xo_spec(),
        ),
        compiler_params=pltpu.CompilerParams(
            dimension_semantics=("parallel", "parallel"),
            vmem_limit_bytes=vmem_limit),
        cost_estimate=cost,
    )(x, p["caw1"], p["cab1"], p["caw2"], p["cab2"],
      p["spw1"], p["spb1"], p["spmt"], p["spb2"])

    # (N, G, Cg, S) -> (N, C, Z, Y, X): contiguous reshape, NO HBM transpose.
    return out.reshape(N, C, Z, Y, X)


# --------------------------------------------------------------------------- #
#  Pure-JAX reference (mirrors the PyTorch forward exactly)
# --------------------------------------------------------------------------- #
def reference_forward(x5, tw, groups):
    def conv3d(x, w, b, pad):
        out = jax.lax.conv_general_dilated(
            x, w, window_strides=(1, 1, 1), padding=[(pad, pad)] * 3,
            dimension_numbers=("NCDHW", "OIDHW", "NCDHW"),
            feature_group_count=groups)
        return out + b.reshape(1, -1, 1, 1, 1)

    def inorm(x):
        mu = jnp.mean(x, axis=(2, 3, 4), keepdims=True)
        var = jnp.mean((x - mu) ** 2, axis=(2, 3, 4), keepdims=True)
        return (x - mu) / jnp.sqrt(var + EPS)

    pooled = (jnp.max(x5, axis=(2, 3, 4), keepdims=True)
              + jnp.mean(x5, axis=(2, 3, 4), keepdims=True))
    h = jnp.tanh(conv3d(pooled, tw["W_ca1"], tw["b_ca1"], 0))
    ch_att = jax.nn.sigmoid(conv3d(h, tw["W_ca2"], tw["b_ca2"], 0))
    x1 = x5 * ch_att
    s = conv3d(x1, tw["W_sp1"], tw["b_sp1"], 0)
    s = jnp.tanh(inorm(s))
    s = conv3d(s, tw["W_sp2"], tw["b_sp2"], 3)
    s = jax.nn.sigmoid(inorm(s))
    N, C, Z, Y, X = x5.shape
    s = jnp.repeat(s, C // groups, axis=1)
    return x5 + x1 * s


# --------------------------------------------------------------------------- #
if __name__ == "__main__":
    # module config: SCAttention(inplane=8, ratio=4, groups=2)
    C, ratio, groups = 8, 4, 2
    cg = C // groups          # 4
    cr = C // ratio           # 2
    crg = cr // groups        # 1
    ch2 = C // 2              # 4
    ch2g = ch2 // groups      # 2
    N, Z, Y, X = 2, 8, 8, 8

    key = jax.random.PRNGKey(0)
    ks = jax.random.split(key, 9)

    def w_init(k, shape):
        fan_in = int(np.prod(shape[1:]))
        return (jax.random.normal(k, shape, jnp.float32) / np.sqrt(fan_in))

    # PyTorch-layout weights (Conv3d: (out, in/groups, kz, ky, kx)), deterministic init
    tw = dict(
        W_ca1=w_init(ks[0], (cr, cg, 1, 1, 1)),
        b_ca1=0.1 * jax.random.normal(ks[1], (cr,), jnp.float32),
        W_ca2=w_init(ks[2], (C, crg, 1, 1, 1)),
        b_ca2=0.1 * jax.random.normal(ks[3], (C,), jnp.float32),
        W_sp1=w_init(ks[4], (ch2, cg, 1, 1, 1)),
        b_sp1=0.1 * jax.random.normal(ks[5], (ch2,), jnp.float32),
        W_sp2=w_init(ks[6], (groups, ch2g, 7, 7, 7)),
        b_sp2=0.1 * jax.random.normal(ks[7], (groups,), jnp.float32),
    )
    x5 = jax.random.normal(ks[8], (N, C, Z, Y, X), jnp.float32)

    params = build_kernel_params(tw, groups, Z, Y, X)

    out = sc_attention_pallas(x5, params, groups)
    out = jax.block_until_ready(out)

    ref = jax.block_until_ready(reference_forward(x5, tw, groups))
    # tolerance accommodates the bf16 Toeplitz matmul path (f32 accumulate)
    np.testing.assert_allclose(np.asarray(out), np.asarray(ref), atol=2e-2, rtol=2e-2)

    print("KERNEL_OK")
</pallas_src>

<mosaic_0001>
module attributes {stable_mosaic.version = 11 : i64} {
  func.func @sc_attention_kernel(%arg0: i32, %arg1: i32, %arg2: memref<2x1x4x512xf32, #tpu.memory_space<vmem>>, %arg3: memref<1x4x1xf32, #tpu.memory_space<vmem>>, %arg4: memref<1x1x1xf32, #tpu.memory_space<vmem>>, %arg5: memref<1x1x4xf32, #tpu.memory_space<vmem>>, %arg6: memref<1x1x4xf32, #tpu.memory_space<vmem>>, %arg7: memref<1x2x4xf32, #tpu.memory_space<vmem>>, %arg8: memref<1x2x1xf32, #tpu.memory_space<vmem>>, %arg9: memref<1x2x512x512xbf16, #tpu.memory_space<vmem>>, %arg10: memref<1x1x1xf32, #tpu.memory_space<vmem>>, %arg11: memref<2x1x4x512xf32, #tpu.memory_space<vmem>>) attributes {dimension_semantics = [#tpu.dimension_semantics<parallel>, #tpu.dimension_semantics<parallel>], iteration_bounds = array<i64: 2, 1>, scalar_prefetch = 0 : i64, scratch_operands = 0 : i64, tpu.core_type = #tpu.core_type<tc>, window_params = [{transform_indices = @transform_0, window_bounds = array<i64: 2, 1, 4, 512>}, {transform_indices = @transform_1, window_bounds = array<i64: 1, 4, 1>}, {transform_indices = @transform_2, window_bounds = array<i64: 1, 1, 1>}, {transform_indices = @transform_3, window_bounds = array<i64: 1, 1, 4>}, {transform_indices = @transform_4, window_bounds = array<i64: 1, 1, 4>}, {transform_indices = @transform_5, window_bounds = array<i64: 1, 2, 4>}, {transform_indices = @transform_6, window_bounds = array<i64: 1, 2, 1>}, {transform_indices = @transform_7, window_bounds = array<i64: 1, 2, 512, 512>}, {transform_indices = @transform_8, window_bounds = array<i64: 1, 1, 1>}, {transform_indices = @transform_9, window_bounds = array<i64: 2, 1, 4, 512>}]} {
    %c0 = arith.constant 0 : index
    %c0_0 = arith.constant 0 : index
    %c0_1 = arith.constant 0 : index
    %c0_2 = arith.constant 0 : index
    %0 = vector.load %arg2[%c0, %c0_0, %c0_1, %c0_2] : memref<2x1x4x512xf32, #tpu.memory_space<vmem>>, vector<2x1x4x512xf32>
    %1 = vector.shape_cast %0 : vector<2x1x4x512xf32> to vector<2x4x512xf32>
    %cst = arith.constant dense<0xFF800000> : vector<2x4xf32>
    %2 = vector.multi_reduction <maximumf>, %1, %cst [2] : vector<2x4x512xf32> to vector<2x4xf32>
    %cst_3 = arith.constant dense<0.000000e+00> : vector<2x4xf32>
    %3 = vector.multi_reduction <add>, %1, %cst_3 [2] : vector<2x4x512xf32> to vector<2x4xf32>
    %cst_4 = arith.constant 5.120000e+02 : f32
    %4 = vector.broadcast %cst_4 : f32 to vector<2x4xf32>
    %5 = arith.divf %3, %4 : vector<2x4xf32>
    %6 = arith.addf %2, %5 : vector<2x4xf32>
    %c0_5 = arith.constant 0 : index
    %c0_6 = arith.constant 0 : index
    %c0_7 = arith.constant 0 : index
    %7 = vector.load %arg3[%c0_5, %c0_6, %c0_7] : memref<1x4x1xf32, #tpu.memory_space<vmem>>, vector<1x4x1xf32>
    %8 = vector.shape_cast %7 : vector<1x4x1xf32> to vector<4x1xf32>
    %c0_8 = arith.constant 0 : index
    %c0_9 = arith.constant 0 : index
    %c0_10 = arith.constant 0 : index
    %9 = vector.load %arg4[%c0_8, %c0_9, %c0_10] : memref<1x1x1xf32, #tpu.memory_space<vmem>>, vector<1x1x1xf32>
    %10 = vector.shape_cast %9 : vector<1x1x1xf32> to vector<1x1xf32>
    %11 = vector.extract_strided_slice %6 {offsets = [0, 0], sizes = [2, 1], strides = [1, 1]} : vector<2x4xf32> to vector<2x1xf32>
    %12 = vector.extract_strided_slice %8 {offsets = [0, 0], sizes = [1, 1], strides = [1, 1]} : vector<4x1xf32> to vector<1x1xf32>
    %13 = vector.broadcast %12 : vector<1x1xf32> to vector<2x1xf32>
    %14 = arith.mulf %11, %13 : vector<2x1xf32>
    %15 = vector.broadcast %10 : vector<1x1xf32> to vector<2x1xf32>
    %16 = arith.addf %15, %14 : vector<2x1xf32>
    %17 = vector.extract_strided_slice %6 {offsets = [0, 1], sizes = [2, 1], strides = [1, 1]} : vector<2x4xf32> to vector<2x1xf32>
    %18 = vector.extract_strided_slice %8 {offsets = [1, 0], sizes = [1, 1], strides = [1, 1]} : vector<4x1xf32> to vector<1x1xf32>
    %19 = vector.broadcast %18 : vector<1x1xf32> to vector<2x1xf32>
    %20 = arith.mulf %17, %19 : vector<2x1xf32>
    %21 = arith.addf %16, %20 : vector<2x1xf32>
    %22 = vector.extract_strided_slice %6 {offsets = [0, 2], sizes = [2, 1], strides = [1, 1]} : vector<2x4xf32> to vector<2x1xf32>
    %23 = vector.extract_strided_slice %8 {offsets = [2, 0], sizes = [1, 1], strides = [1, 1]} : vector<4x1xf32> to vector<1x1xf32>
    %24 = vector.broadcast %23 : vector<1x1xf32> to vector<2x1xf32>
    %25 = arith.mulf %22, %24 : vector<2x1xf32>
    %26 = arith.addf %21, %25 : vector<2x1xf32>
    %27 = vector.extract_strided_slice %6 {offsets = [0, 3], sizes = [2, 1], strides = [1, 1]} : vector<2x4xf32> to vector<2x1xf32>
    %28 = vector.extract_strided_slice %8 {offsets = [3, 0], sizes = [1, 1], strides = [1, 1]} : vector<4x1xf32> to vector<1x1xf32>
    %29 = vector.broadcast %28 : vector<1x1xf32> to vector<2x1xf32>
    %30 = arith.mulf %27, %29 : vector<2x1xf32>
    %31 = arith.addf %26, %30 : vector<2x1xf32>
    %32 = math.tanh %31 : vector<2x1xf32>
    %c0_11 = arith.constant 0 : index
    %c0_12 = arith.constant 0 : index
    %c0_13 = arith.constant 0 : index
    %33 = vector.load %arg5[%c0_11, %c0_12, %c0_13] : memref<1x1x4xf32, #tpu.memory_space<vmem>>, vector<1x1x4xf32>
    %34 = vector.shape_cast %33 : vector<1x1x4xf32> to vector<1x4xf32>
    %c0_14 = arith.constant 0 : index
    %c0_15 = arith.constant 0 : index
    %c0_16 = arith.constant 0 : index
    %35 = vector.load %arg6[%c0_14, %c0_15, %c0_16] : memref<1x1x4xf32, #tpu.memory_space<vmem>>, vector<1x1x4xf32>
    %36 = vector.shape_cast %35 : vector<1x1x4xf32> to vector<1x4xf32>
    %37 = vector.broadcast %32 : vector<2x1xf32> to vector<2x4xf32>
    %38 = vector.broadcast %34 : vector<1x4xf32> to vector<2x4xf32>
    %39 = arith.mulf %37, %38 : vector<2x4xf32>
    %40 = vector.broadcast %36 : vector<1x4xf32> to vector<2x4xf32>
    %41 = arith.addf %40, %39 : vector<2x4xf32>
    %42 = arith.negf %41 : vector<2x4xf32>
    %43 = math.exp %42 : vector<2x4xf32>
    %cst_17 = arith.constant 1.000000e+00 : f32
    %44 = vector.broadcast %cst_17 : f32 to vector<2x4xf32>
    %45 = arith.addf %44, %43 : vector<2x4xf32>
    %46 = arith.divf %44, %45 : vector<2x4xf32>
    %47 = vector.shape_cast %46 : vector<2x4xf32> to vector<2x4x1xf32>
    %48 = vector.broadcast %47 : vector<2x4x1xf32> to vector<2x4x512xf32>
    %49 = arith.mulf %1, %48 : vector<2x4x512xf32>
    %c0_18 = arith.constant 0 : index
    %c0_19 = arith.constant 0 : index
    %c0_20 = arith.constant 0 : index
    %50 = vector.load %arg7[%c0_18, %c0_19, %c0_20] : memref<1x2x4xf32, #tpu.memory_space<vmem>>, vector<1x2x4xf32>
    %51 = vector.shape_cast %50 : vector<1x2x4xf32> to vector<2x4xf32>
    %c0_21 = arith.constant 0 : index
    %c0_22 = arith.constant 0 : index
    %c0_23 = arith.constant 0 : index
    %52 = vector.load %arg8[%c0_21, %c0_22, %c0_23] : memref<1x2x1xf32, #tpu.memory_space<vmem>>, vector<1x2x1xf32>
    %53 = vector.shape_cast %52 : vector<1x2x1xf32> to vector<2x1xf32>
    %54 = vector.shape_cast %53 : vector<2x1xf32> to vector<1x2x1xf32>
    %55 = vector.extract_strided_slice %51 {offsets = [0, 0], sizes = [2, 1], strides = [1, 1]} : vector<2x4xf32> to vector<2x1xf32>
    %56 = vector.shape_cast %55 : vector<2x1xf32> to vector<2xf32>
    %57 = vector.shape_cast %56 : vector<2xf32> to vector<1x2x1xf32>
    %58 = vector.extract_strided_slice %49 {offsets = [0, 0, 0], sizes = [2, 1, 512], strides = [1, 1, 1]} : vector<2x4x512xf32> to vector<2x1x512xf32>
    %59 = vector.broadcast %57 : vector<1x2x1xf32> to vector<2x2x512xf32>
    %60 = vector.broadcast %58 : vector<2x1x512xf32> to vector<2x2x512xf32>
    %61 = arith.mulf %59, %60 : vector<2x2x512xf32>
    %62 = vector.broadcast %54 : vector<1x2x1xf32> to vector<2x2x512xf32>
    %63 = arith.addf %62, %61 : vector<2x2x512xf32>
    %64 = vector.extract_strided_slice %51 {offsets = [0, 1], sizes = [2, 1], strides = [1, 1]} : vector<2x4xf32> to vector<2x1xf32>
    %65 = vector.shape_cast %64 : vector<2x1xf32> to vector<2xf32>
    %66 = vector.shape_cast %65 : vector<2xf32> to vector<1x2x1xf32>
    %67 = vector.extract_strided_slice %49 {offsets = [0, 1, 0], sizes = [2, 1, 512], strides = [1, 1, 1]} : vector<2x4x512xf32> to vector<2x1x512xf32>
    %68 = vector.broadcast %66 : vector<1x2x1xf32> to vector<2x2x512xf32>
    %69 = vector.broadcast %67 : vector<2x1x512xf32> to vector<2x2x512xf32>
    %70 = arith.mulf %68, %69 : vector<2x2x512xf32>
    %71 = arith.addf %63, %70 : vector<2x2x512xf32>
    %72 = vector.extract_strided_slice %51 {offsets = [0, 2], sizes = [2, 1], strides = [1, 1]} : vector<2x4xf32> to vector<2x1xf32>
    %73 = vector.shape_cast %72 : vector<2x1xf32> to vector<2xf32>
    %74 = vector.shape_cast %73 : vector<2xf32> to vector<1x2x1xf32>
    %75 = vector.extract_strided_slice %49 {offsets = [0, 2, 0], sizes = [2, 1, 512], strides = [1, 1, 1]} : vector<2x4x512xf32> to vector<2x1x512xf32>
    %76 = vector.broadcast %74 : vector<1x2x1xf32> to vector<2x2x512xf32>
    %77 = vector.broadcast %75 : vector<2x1x512xf32> to vector<2x2x512xf32>
    %78 = arith.mulf %76, %77 : vector<2x2x512xf32>
    %79 = arith.addf %71, %78 : vector<2x2x512xf32>
    %80 = vector.extract_strided_slice %51 {offsets = [0, 3], sizes = [2, 1], strides = [1, 1]} : vector<2x4xf32> to vector<2x1xf32>
    %81 = vector.shape_cast %80 : vector<2x1xf32> to vector<2xf32>
    %82 = vector.shape_cast %81 : vector<2xf32> to vector<1x2x1xf32>
    %83 = vector.extract_strided_slice %49 {offsets = [0, 3, 0], sizes = [2, 1, 512], strides = [1, 1, 1]} : vector<2x4x512xf32> to vector<2x1x512xf32>
    %84 = vector.broadcast %82 : vector<1x2x1xf32> to vector<2x2x512xf32>
    %85 = vector.broadcast %83 : vector<2x1x512xf32> to vector<2x2x512xf32>
    %86 = arith.mulf %84, %85 : vector<2x2x512xf32>
    %87 = arith.addf %79, %86 : vector<2x2x512xf32>
    %cst_24 = arith.constant dense<0.000000e+00> : vector<2x2xf32>
    %88 = vector.multi_reduction <add>, %87, %cst_24 [2] : vector<2x2x512xf32> to vector<2x2xf32>
    %89 = vector.shape_cast %88 : vector<2x2xf32> to vector<2x2x1xf32>
    %cst_25 = arith.constant 5.120000e+02 : f32
    %90 = vector.broadcast %cst_25 : f32 to vector<2x2x1xf32>
    %91 = arith.divf %89, %90 : vector<2x2x1xf32>
    %92 = vector.broadcast %91 : vector<2x2x1xf32> to vector<2x2x512xf32>
    %93 = arith.subf %87, %92 : vector<2x2x512xf32>
    %94 = arith.mulf %93, %93 : vector<2x2x512xf32>
    %cst_26 = arith.constant dense<0.000000e+00> : vector<2x2xf32>
    %95 = vector.multi_reduction <add>, %94, %cst_26 [2] : vector<2x2x512xf32> to vector<2x2xf32>
    %96 = vector.shape_cast %95 : vector<2x2xf32> to vector<2x2x1xf32>
    %cst_27 = arith.constant 5.120000e+02 : f32
    %97 = vector.broadcast %cst_27 : f32 to vector<2x2x1xf32>
    %98 = arith.divf %96, %97 : vector<2x2x1xf32>
    %cst_28 = arith.constant 9.99999974E-6 : f32
    %99 = vector.broadcast %cst_28 : f32 to vector<2x2x1xf32>
    %100 = arith.addf %98, %99 : vector<2x2x1xf32>
    %101 = math.rsqrt %100 : vector<2x2x1xf32>
    %102 = vector.broadcast %101 : vector<2x2x1xf32> to vector<2x2x512xf32>
    %103 = arith.mulf %93, %102 : vector<2x2x512xf32>
    %104 = math.tanh %103 : vector<2x2x512xf32>
    %cst_29 = arith.constant 0.000000e+00 : f32
    %105 = vector.broadcast %cst_29 : f32 to vector<2x512xf32>
    %106 = vector.extract_strided_slice %104 {offsets = [0, 0, 0], sizes = [2, 1, 512], strides = [1, 1, 1]} : vector<2x2x512xf32> to vector<2x1x512xf32>
    %107 = vector.shape_cast %106 : vector<2x1x512xf32> to vector<2x512xf32>
    %108 = arith.truncf %107 : vector<2x512xf32> to vector<2x512xbf16>
    %c0_30 = arith.constant 0 : index
    %c0_31 = arith.constant 0 : index
    %c0_32 = arith.constant 0 : index
    %c0_33 = arith.constant 0 : index
    %109 = vector.load %arg9[%c0_30, %c0_31, %c0_32, %c0_33] : memref<1x2x512x512xbf16, #tpu.memory_space<vmem>>, vector<1x1x512x512xbf16>
    %110 = vector.shape_cast %109 : vector<1x1x512x512xbf16> to vector<512x512xbf16>
    %cst_34 = arith.constant dense<0.000000e+00> : vector<2x512xf32>
    %111 = tpu.matmul %108, %110, %cst_34 {dimension_numbers = #tpu.dot_dimension_numbers<[1], [0], [0], [1], [0, 0, 1, 1], [], []>} : vector<2x512xbf16>, vector<512x512xbf16>, vector<2x512xf32> -> vector<2x512xf32>
    %112 = arith.addf %105, %111 : vector<2x512xf32>
    %113 = vector.extract_strided_slice %104 {offsets = [0, 1, 0], sizes = [2, 1, 512], strides = [1, 1, 1]} : vector<2x2x512xf32> to vector<2x1x512xf32>
    %114 = vector.shape_cast %113 : vector<2x1x512xf32> to vector<2x512xf32>
    %115 = arith.truncf %114 : vector<2x512xf32> to vector<2x512xbf16>
    %c0_35 = arith.constant 0 : index
    %c1 = arith.constant 1 : index
    %c0_36 = arith.constant 0 : index
    %c0_37 = arith.constant 0 : index
    %116 = vector.load %arg9[%c0_35, %c1, %c0_36, %c0_37] : memref<1x2x512x512xbf16, #tpu.memory_space<vmem>>, vector<1x1x512x512xbf16>
    %117 = vector.shape_cast %116 : vector<1x1x512x512xbf16> to vector<512x512xbf16>
    %cst_38 = arith.constant dense<0.000000e+00> : vector<2x512xf32>
    %118 = tpu.matmul %115, %117, %cst_38 {dimension_numbers = #tpu.dot_dimension_numbers<[1], [0], [0], [1], [0, 0, 1, 1], [], []>} : vector<2x512xbf16>, vector<512x512xbf16>, vector<2x512xf32> -> vector<2x512xf32>
    %119 = arith.addf %112, %118 : vector<2x512xf32>
    %c0_39 = arith.constant 0 : index
    %c0_40 = arith.constant 0 : index
    %c0_41 = arith.constant 0 : index
    %120 = vector.load %arg10[%c0_39, %c0_40, %c0_41] : memref<1x1x1xf32, #tpu.memory_space<vmem>>, vector<1x1x1xf32>
    %121 = vector.shape_cast %120 : vector<1x1x1xf32> to vector<1x1xf32>
    %122 = vector.broadcast %121 : vector<1x1xf32> to vector<2x512xf32>
    %123 = arith.addf %119, %122 : vector<2x512xf32>
    %cst_42 = arith.constant dense<0.000000e+00> : vector<2xf32>
    %124 = vector.multi_reduction <add>, %123, %cst_42 [1] : vector<2x512xf32> to vector<2xf32>
    %125 = vector.shape_cast %124 : vector<2xf32> to vector<2x1xf32>
    %cst_43 = arith.constant 5.120000e+02 : f32
    %126 = vector.broadcast %cst_43 : f32 to vector<2x1xf32>
    %127 = arith.divf %125, %126 : vector<2x1xf32>
    %128 = vector.broadcast %127 : vector<2x1xf32> to vector<2x512xf32>
    %129 = arith.subf %123, %128 : vector<2x512xf32>
    %130 = arith.mulf %129, %129 : vector<2x512xf32>
    %cst_44 = arith.constant dense<0.000000e+00> : vector<2xf32>
    %131 = vector.multi_reduction <add>, %130, %cst_44 [1] : vector<2x512xf32> to vector<2xf32>
    %132 = vector.shape_cast %131 : vector<2xf32> to vector<2x1xf32>
    %cst_45 = arith.constant 5.120000e+02 : f32
    %133 = vector.broadcast %cst_45 : f32 to vector<2x1xf32>
    %134 = arith.divf %132, %133 : vector<2x1xf32>
    %cst_46 = arith.constant 9.99999974E-6 : f32
    %135 = vector.broadcast %cst_46 : f32 to vector<2x1xf32>
    %136 = arith.addf %134, %135 : vector<2x1xf32>
    %137 = math.rsqrt %136 : vector<2x1xf32>
    %138 = vector.broadcast %137 : vector<2x1xf32> to vector<2x512xf32>
    %139 = arith.mulf %129, %138 : vector<2x512xf32>
    %140 = arith.negf %139 : vector<2x512xf32>
    %141 = math.exp %140 : vector<2x512xf32>
    %cst_47 = arith.constant 1.000000e+00 : f32
    %142 = vector.broadcast %cst_47 : f32 to vector<2x512xf32>
    %143 = arith.addf %142, %141 : vector<2x512xf32>
    %144 = arith.divf %142, %143 : vector<2x512xf32>
    %145 = vector.shape_cast %144 : vector<2x512xf32> to vector<2x1x512xf32>
    %146 = vector.broadcast %145 : vector<2x1x512xf32> to vector<2x4x512xf32>
    %147 = arith.mulf %49, %146 : vector<2x4x512xf32>
    %148 = arith.addf %1, %147 : vector<2x4x512xf32>
    %c0_48 = arith.constant 0 : index
    %c0_49 = arith.constant 0 : index
    %c0_50 = arith.constant 0 : index
    %c0_51 = arith.constant 0 : index
    %149 = vector.load %arg11[%c0_48, %c0_49, %c0_50, %c0_51] : memref<2x1x4x512xf32, #tpu.memory_space<vmem>>, vector<2x1x4x512xf32>
    %150 = vector.shape_cast %149 : vector<2x1x4x512xf32> to vector<2x4x512xf32>
    %151 = vector.shape_cast %148 : vector<2x4x512xf32> to vector<2x1x4x512xf32>
    tpu.vector_store %arg11[%c0_48, %c0_49, %c0_50, %c0_51], %151 {strides = array<i32>} : memref<2x1x4x512xf32, #tpu.memory_space<vmem>>, vector<2x1x4x512xf32>,
    return
  }
  func.func @transform_0(%arg0: i32, %arg1: i32) -> (i32, i32, i32, i32) {
    %c0_i32 = arith.constant 0 : i32
    %c0_i32_0 = arith.constant 0 : i32
    %c0_i32_1 = arith.constant 0 : i32
    return %arg1, %arg0, %c0_i32, %c0_i32_0 : i32, i32, i32, i32
  }
  func.func @transform_1(%arg0: i32, %arg1: i32) -> (i32, i32, i32) {
    %c0_i32 = arith.constant 0 : i32
    %c0_i32_0 = arith.constant 0 : i32
    %c0_i32_1 = arith.constant 0 : i32
    return %arg0, %c0_i32, %c0_i32_0 : i32, i32, i32
  }
  func.func @transform_2(%arg0: i32, %arg1: i32) -> (i32, i32, i32) {
    %c0_i32 = arith.constant 0 : i32
    %c0_i32_0 = arith.constant 0 : i32
    %c0_i32_1 = arith.constant 0 : i32
    return %arg0, %c0_i32, %c0_i32_0 : i32, i32, i32
  }
  func.func @transform_3(%arg0: i32, %arg1: i32) -> (i32, i32, i32) {
    %c0_i32 = arith.constant 0 : i32
    %c0_i32_0 = arith.constant 0 : i32
    %c0_i32_1 = arith.constant 0 : i32
    return %arg0, %c0_i32, %c0_i32_0 : i32, i32, i32
  }
  func.func @transform_4(%arg0: i32, %arg1: i32) -> (i32, i32, i32) {
    %c0_i32 = arith.constant 0 : i32
    %c0_i32_0 = arith.constant 0 : i32
    %c0_i32_1 = arith.constant 0 : i32
    return %arg0, %c0_i32, %c0_i32_0 : i32, i32, i32
  }
  func.func @transform_5(%arg0: i32, %arg1: i32) -> (i32, i32, i32) {
    %c0_i32 = arith.constant 0 : i32
    %c0_i32_0 = arith.constant 0 : i32
    %c0_i32_1 = arith.constant 0 : i32
    return %arg0, %c0_i32, %c0_i32_0 : i32, i32, i32
  }
  func.func @transform_6(%arg0: i32, %arg1: i32) -> (i32, i32, i32) {
    %c0_i32 = arith.constant 0 : i32
    %c0_i32_0 = arith.constant 0 : i32
    %c0_i32_1 = arith.constant 0 : i32
    return %arg0, %c0_i32, %c0_i32_0 : i32, i32, i32
  }
  func.func @transform_7(%arg0: i32, %arg1: i32) -> (i32, i32, i32, i32) {
    %c0_i32 = arith.constant 0 : i32
    %c0_i32_0 = arith.constant 0 : i32
    %c0_i32_1 = arith.constant 0 : i32
    %c0_i32_2 = arith.constant 0 : i32
    return %arg0, %c0_i32, %c0_i32_0, %c0_i32_1 : i32, i32, i32, i32
  }
  func.func @transform_8(%arg0: i32, %arg1: i32) -> (i32, i32, i32) {
    %c0_i32 = arith.constant 0 : i32
    %c0_i32_0 = arith.constant 0 : i32
    %c0_i32_1 = arith.constant 0 : i32
    return %arg0, %c0_i32, %c0_i32_0 : i32, i32, i32
  }
  func.func @transform_9(%arg0: i32, %arg1: i32) -> (i32, i32, i32, i32) {
    %c0_i32 = arith.constant 0 : i32
    %c0_i32_0 = arith.constant 0 : i32
    %c0_i32_1 = arith.constant 0 : i32
    return %arg1, %arg0, %c0_i32, %c0_i32_0 : i32, i32, i32, i32
  }
}

</mosaic_0001>

<bundles_post_ra>
// kernel: tpu_custom_call.1
= control target key start
LH: loop header
LB: loop body
LE: loop exit
PB: predicated region body
PF: predicated region fallthrough
CT: control target
= control target key end

     0   :  { %s5815_s0 = inlined_call_operand.hbm [shape: f32[2,2,4,512], index: 0, kind: input, shape index: {}]   ;;  %s5816_s1 = inlined_call_operand.vmem [shape: f32[2,4,1], index: 1, kind: input, shape index: {}]   ;;  %s5817_s2 = inlined_call_operand.vmem [shape: f32[2,1,1], index: 2, kind: input, shape index: {}]   ;;  %s5818_s3 = inlined_call_operand.hbm [shape: f32[2,1,4], index: 3, kind: input, shape index: {}]   ;;  %s5819_s4 = inlined_call_operand.hbm [shape: f32[2,1,4], index: 4, kind: input, shape index: {}]   ;;  %s5820_s5 = inlined_call_operand.hbm [shape: f32[2,2,4], index: 5, kind: input, shape index: {}]   ;;  %s5821_s6 = inlined_call_operand.vmem [shape: f32[2,2,1], index: 6, kind: input, shape index: {}]   ;;  %s5822_s7 = inlined_call_operand.hbm [shape: bf16[2,2,512,512], index: 7, kind: input, shape index: {}]   ;;  %s5823_s8 = inlined_call_operand.vmem [shape: f32[2,1,1], index: 8, kind: input, shape index: {}]   ;;  %s5824_s9 = inlined_call_operand.hbm [shape: f32[2,2,4,512], index: 9, kind: output, shape index: {}]  }
   0x1   :  { %5839 = sst [smem:[#allocation23_spill]] %s5815_s0 }
   0x2   :  { %5840 = sst [smem:[#allocation24_spill]] %s5817_s2 }
   0x3   :  { %5841 = sst [smem:[#allocation25_spill]] %s5818_s3 }
   0x4   :  { %5842 = sst [smem:[#allocation26_spill]] %s5820_s5 }
   0x5   :  { %5843 = sst [smem:[#allocation27_spill]] %s5821_s6 }
   0x6   :  { %5844 = sst [smem:[#allocation28_spill]] %s5823_s8 }
   0x7   :  { %5845 = sst [smem:[#allocation29_spill]] %s5824_s9 }
   0x8   :  { %14 = vsyncpa [#allocation3], 0 }
   0x9   :  { %16 = vsyncpa [#allocation3 + $0x1], 0 }
   0xa   :  { %17 = vsyncpa [#allocation6], 0 }
   0xb   :  { %19 = vsyncpa [#allocation6 + $0x1], 0 }
   0xc   :  { %20 = vsyncpa [#allocation9], 0 }
   0xd   :  { %22 = vsyncpa [#allocation9 + $0x1], 0 }
   0xe   :  { %23 = vsyncpa [#allocation4], 0 }
   0xf   :  { %25 = vsyncpa [#allocation4 + $0x1], 0  ;;  %s4809_s30 = smov 0   ;;  %s4811_s10 = smov 0  }
  0x10   :  { %s4813_s11 = smov 0   ;;  %s4815_s12 = smov 0  }
  0x11   :  { %s4817_s13 = smov 0   ;;  %s4819_s14 = smov 0  }
  0x12 LB: > { %5846 = sst [smem:[#allocation16_spill]] %s4719_s30  ;;  %s4840_s15 = sadd.s32 4294967295, %s4739_s14   ;;  %s4739_s14 = sphi %s4819_s14, %s31_s14   ;;  %s4735_s13 = sphi %s4817_s13, %s5886_s13   ;;  %s4731_s12 = sphi %s4815_s12, %s5885_s12   ;;  %s4727_s11 = sphi %s4813_s11, %s5881_s11   ;;  %s4723_s10 = sphi %s4811_s10, %s5884_s10   ;;  %s4719_s30 = sphi %s4809_s30, %s5883_s30  }
  0x13   : > { %5847 = sst [smem:[#allocation17_spill]] %s4727_s11  ;;  %s3542_s16 = sadd.s32 4294967294, %s4739_s14  }
  0x14   : > { %5848 = sst [smem:[#allocation18_spill]] %s4739_s14  ;;  %s43_s17 = sadd.s32 1, %s4735_s13 }
  0x15   : > { %s52_s18 = sadd.s32 1, %s4727_s11  ;;  %p45_p0 = scmp.ge.s32.totalorder %s43_s17, 2 }
  0x16   : > { %p59_p1 = scmp.ne.s32.totalorder %s4727_s11, %s4723_s10  ;;  %p60_p2 = scmp.eq.s32.totalorder %s4739_s14, 0 }
  0x17   : > { %p65_p3 = scmp.ne.s32.totalorder %s4723_s10, %s4719_s30  ;;  %s5888_s17 = smov (%p45_p0, %s43_s17), 0 }
  0x18   : > { %5849 = sst [smem:[#allocation19_spill]] %s5888_s17  ;;  %p4852_p4 = por %p60_p2, %p59_p1 }
  0x19   : > { %p66_p5 = scmp.eq.s32.totalorder %s4840_s15, 0  ;;  %s48_s20 = ssub.s32 %s4735_s13, %s5888_s17 }
  0x1a   : > { %p299_p6 = scmp.eq.s32.totalorder %s4840_s15, 1  ;;  %p50_p7 = scmp.eq.s32.totalorder %s48_s20, 0 }
  0x1b   : > { %p4860_p8 = por %p66_p5, %p65_p3  ;;  %p305_p10 = scmp.eq.s32.totalorder %s3542_s16, 1 }
  0x1c   : > { %p4864_p9 = por %p299_p6, %p59_p1  ;;  %p3995_p13 = scmp.lt.s32.totalorder %s4739_s14, 2 }
  0x1d   : > { %s5851_s21 = scalar_select %p4860_p8, 1, 0 }
  0x1e   : > { %s5852_s22 = scalar_select %p4864_p9, 1, 0 }
  0x1f   : > { %s4869_s23 = scalar_select %p50_p7, %s4727_s11, %s52_s18  }
  0x20   : > { %5853 = sst [smem:[#allocation20_spill]] %s5852_s22  ;;  %p4871_p11 = por %p305_p10, %p65_p3 }
  0x21   : > { %5854 = sst [smem:[#allocation21_spill]] %s4869_s23  ;;  %s4878_s25 = sand.u32 1, %s4727_s11  }
  0x22   : > { %s5855_s24 = scalar_select %p4871_p11, 1, 0 }
  0x23   : > { %p4883_p0 = pnand %p3995_p13, %p4852_p4  ;;  %s3548_s28 = sshll.u32 %s4735_s13, 4 }
  0x24   : > { %5856 = sst [smem:[#allocation22_spill]] %s5855_s24  ;;  %s365_s29 = scalar_lea.vmem [#allocation5], %s4878_s25 }
  0x25   : > { %s5857_s27 = scalar_select %p4883_p0, 1, 0 }
  0x26   : > { %s372_s16 = sshll.u32 %s365_s29, 4  ;;  %s5858_s3 = sld [smem:[#allocation25_spill]]  ;;  %s4894_s16 = int_to_ptr.vmem [resolvable:$true] %s372_s16 }
  0x27   : > { %s4899_s23 = scalar_lea.hbm %s5819_s4, %s3548_s28  ;;  %s5859_s11 = sand.u32 1, %s4739_s14  }
  0x28   : > { %s4903_s24 = scalar_lea.sflag [#allocation6], %s5859_s11  ;;  %p4909_p2 = pneg %p4883_p0 }
  0x2c   : > { %s4892_s17 = scalar_lea.hbm %s5858_s3, %s3548_s28  ;;  %s4504_s26 = scalar_lea.hbm %s5858_s3, 32 }
  0x2d   : > { %s4499_s29 = scalar_lea.hbm %s4892_s17, 16  ;;  %p4505_p5 = scmp.lt.u32.totalorder %s4892_s17, %s5858_s3 }
  0x2e   : > { %p4500_p1 = scmp.ne.s32.totalorder %s4892_s17, %s4499_s29  ;;  %p4506_p6 = scmp.lt.u32.totalorder %s4504_s26, %s4499_s29 }
  0x2f   : > { %p4508_p10 = scmp.lt.u32.totalorder %s4499_s29, %s4892_s17 }
  0x30   : > { %p4502_p3 = pnand %p4909_p2, %p4500_p1  ;;  %p4507_p7 = por %p4506_p6, %p4505_p5 }
  0x32   : > { %p4503_p4 = pneg %p4502_p3  ;;  %p4509_p13 = por %p4508_p10, %p4507_p7 }
  0x34   : > { %p4510_p12 = pnand %p4509_p13, %p4503_p4 }
  0x36   : > { %4513 = shalt.err (!%p4510_p12)
}
  0x37   : > { %s4514_s11 = scalar_lea.vmem %s4894_s16, 16  ;;  %s4741_s30 = smov [#allocation5]  }
  0x38   : > { %p4515_p1 = scmp.ne.s32.totalorder %s4894_s16, %s4514_s11  ;;  %s4519_s20 = sshll.u32 %s4741_s30, 4  ;;  %s4520_s20 = int_to_ptr.vmem [resolvable:$false] %s4519_s20 }
  0x39   : > { %s4521_s28 = scalar_lea.vmem %s4520_s20, 32  ;;  %p4522_p9 = scmp.lt.s32.totalorder %s4894_s16, %s4520_s20 }
  0x3a   : > { %p4517_p3 = pnand %p4515_p1, %p4909_p2  ;;  %p4523_p8 = scmp.lt.s32.totalorder %s4521_s28, %s4514_s11 }
  0x3c   : > { %p4518_p11 = pneg %p4517_p3  ;;  %p4524_p5 = por %p4523_p8, %p4522_p9 }
  0x3e   : > { %p4525_p6 = pnand %p4524_p5, %p4518_p11 }
  0x40   : > { %4528 = shalt.err (!%p4525_p6)
}
  0x41   : > { %3981 = dma.hbm_to_vmem [thread:$0]  (!%p4883_p0), %s4892_s17, 16, %s4894_s16, %s4903_s24  }
  0x42   : > { %p3555_p12 = scmp.ge.s32.totalorder %s4739_s14, 1  ;;  %p446_p4 = scmp.lt.s32.totalorder %s4739_s14, 3 }
  0x43   : > { %s3550_s29 = sshll.u32 %s4878_s25, 1  ;;  %s3551_s19 = sshll.u32 %s4735_s13, 5 }
  0x44   : > { %p4936_p7 = pnand %p3555_p12, %p446_p4  ;;  %s400_s11 = scalar_lea.vmem [#allocation8], %s3550_s29 }
  0x45   : > { %s407_s30 = sshll.u32 %s400_s11, 4  ;;  %s5862_s5 = sld [smem:[#allocation26_spill]]  ;;  %s408_s30 = int_to_ptr.vmem [resolvable:$true] %s407_s30 }
  0x46   : > { %s5861_s26 = scalar_select %p4936_p7, 1, 0 }
  0x47   : > { %s5863_s17 = sand.u32 1, %s4739_s14  }
  0x48   : > { %s4948_s16 = scalar_lea.sflag [#allocation9], %s5863_s17 }
  0x4b   : > { %s4944_s3 = scalar_lea.hbm %s5862_s5, %s3551_s19  ;;  %s4534_s9 = scalar_lea.hbm %s5862_s5, 64 }
  0x4c   : > { %s4529_s22 = scalar_lea.hbm %s4944_s3, 32  ;;  %p4535_p10 = scmp.lt.u32.totalorder %s4944_s3, %s5862_s5 }
  0x4d   : > { %p4530_p8 = scmp.ne.s32.totalorder %s4944_s3, %s4529_s22  ;;  %p4536_p13 = scmp.lt.u32.totalorder %s4534_s9, %s4529_s22 }
  0x4e   : > { %p4538_p3 = scmp.lt.u32.totalorder %s4529_s22, %s4944_s3 }
  0x4f   : > { %p4532_p9 = pnand %p4530_p8, %p4909_p2  ;;  %p4537_p1 = por %p4536_p13, %p4535_p10 }
  0x51   : > { %p4533_p11 = pneg %p4532_p9  ;;  %p4539_p5 = por %p4538_p3, %p4537_p1 }
  0x53   : > { %p4540_p6 = pnand %p4539_p5, %p4533_p11 }
  0x55   : > { %4543 = shalt.err (!%p4540_p6)
}
  0x56   : > { %s4544_s28 = scalar_lea.vmem %s408_s30, 32  ;;  %s4742_s17 = smov [#allocation8]  }
  0x57   : > { %p4545_p12 = scmp.ne.s32.totalorder %s408_s30, %s4544_s28  ;;  %s4549_s14 = sshll.u32 %s4742_s17, 4  ;;  %s4550_s14 = int_to_ptr.vmem [resolvable:$false] %s4549_s14 }
  0x58   : > { %s4551_s29 = scalar_lea.vmem %s4550_s14, 64  ;;  %p4552_p9 = scmp.lt.s32.totalorder %s408_s30, %s4550_s14 }
  0x59   : > { %p4547_p4 = pnand %p4545_p12, %p4909_p2  ;;  %p4553_p7 = scmp.lt.s32.totalorder %s4551_s29, %s4544_s28 }
  0x5b   : > { %p4548_p8 = pneg %p4547_p4  ;;  %p4554_p0 = por %p4553_p7, %p4552_p9 }
  0x5d   : > { %p4555_p10 = pnand %p4554_p0, %p4548_p8 }
  0x5f   : > { %4558 = shalt.err (!%p4555_p10)
}
  0x60   : > { %p5864_p13 = scmp.ne.s32.totalorder %s5857_s27, 0  ;;  %s3545_s9 = sshll.u32 %s4878_s25, 5 }
  0x61   : > { %s3960_s22 = sshll.u32 %s4735_s13, 8  ;;  %s5865_s0 = sld [smem:[#allocation23_spill]] }
  0x62   : > { %3987 = dma.hbm_to_vmem [thread:$0]  (!%p5864_p13), %s4944_s3, 32, %s408_s30, %s4948_s16  }
  0x63   : > { %s329_s14 = scalar_lea.vmem [#allocation2], %s3545_s9  ;;  %s326_s17 = scalar_lea.sflag [#allocation3], %s4878_s25 }
  0x64   : > { %s339_s28 = sshll.u32 %s329_s14, 4  ;;  %s4975_s28 = int_to_ptr.vmem [resolvable:$true] %s339_s28 }
  0x67   : > { %s4973_s19 = scalar_lea.hbm %s5865_s0, %s3960_s22  ;;  %s4564_s11 = scalar_lea.hbm %s5865_s0, 1024 }
  0x68   : > { %s4559_s29 = scalar_lea.hbm %s4973_s19, 512  ;;  %p4565_p1 = scmp.lt.u32.totalorder %s4973_s19, %s5865_s0 }
  0x69   : > { %p4560_p0 = scmp.ne.s32.totalorder %s4973_s19, %s4559_s29  ;;  %p4566_p3 = scmp.lt.u32.totalorder %s4564_s11, %s4559_s29 }
  0x6a   : > { %p4568_p6 = scmp.lt.u32.totalorder %s4559_s29, %s4973_s19 }
  0x6b   : > { %p4562_p7 = pnand %p4560_p0, %p4909_p2  ;;  %p4567_p5 = por %p4566_p3, %p4565_p1 }
  0x6d   : > { %p4563_p11 = pneg %p4562_p7  ;;  %p4569_p12 = por %p4568_p6, %p4567_p5 }
  0x6f   : > { %p4570_p4 = pnand %p4569_p12, %p4563_p11 }
  0x71   : > { %4573 = shalt.err (!%p4570_p4)
}
  0x72   : > { %s4574_s9 = scalar_lea.vmem %s4975_s28, 512  ;;  %s4743_s14 = smov [#allocation2]  }
  0x73   : > { %p4575_p8 = scmp.ne.s32.totalorder %s4975_s28, %s4574_s9  ;;  %s4579_s3 = sshll.u32 %s4743_s14, 4  ;;  %s4580_s3 = int_to_ptr.vmem [resolvable:$false] %s4579_s3 }
  0x74   : > { %s4581_s30 = scalar_lea.vmem %s4580_s3, 1024  ;;  %p4582_p0 = scmp.lt.s32.totalorder %s4975_s28, %s4580_s3 }
  0x75   : > { %p4577_p9 = pnand %p4575_p8, %p4909_p2  ;;  %p4583_p7 = scmp.lt.s32.totalorder %s4581_s30, %s4574_s9 }
  0x77   : > { %p4578_p10 = pneg %p4577_p9  ;;  %p4584_p1 = por %p4583_p7, %p4582_p0 }
  0x79   : > { %p4585_p3 = pnand %p4584_p1, %p4578_p10 }
  0x7b   : > { %4588 = shalt.err (!%p4585_p3)
}
  0x7c   : > { %s4744_s29 = smov 512   ;;  %s4745_s11 = smov 256  }
  0x7d   : > { %s4746_s22 = smov 16   ;;  %s3552_s20 = sshll.u32 %s4878_s25, 11 }
  0x7e   : > { %3978 = dma.hbm_to_vmem [thread:$0]  (!%p5864_p13), %s4973_s19, 512, %s4975_s28, %s326_s17, %s4744_s29, %s4745_s11, %s4746_s22  }
  0x7f   : > { %s382_s9 = scalar_lea.vmem [#allocation7], %s4878_s25  ;;  %s3961_s3 = sshll.u32 %s4735_s13, 15 }
  0x80   : > { %s389_s14 = sshll.u32 %s382_s9, 4  ;;  %s4589_s30 = scalar_lea.hbm %s4899_s23, 16  ;;  %s390_s14 = int_to_ptr.vmem [resolvable:$true] %s389_s14 }
  0x81   : > { %p4590_p11 = scmp.ne.s32.totalorder %s4899_s23, %s4589_s30  ;;  %s4594_s8 = scalar_lea.hbm %s5819_s4, 32 }
  0x82   : > { %p4595_p12 = scmp.lt.u32.totalorder %s4899_s23, %s5819_s4  ;;  %p4596_p4 = scmp.lt.u32.totalorder %s4594_s8, %s4589_s30 }
  0x83   : > { %p4592_p5 = pnand %p4590_p11, %p4909_p2  ;;  %p4598_p9 = scmp.lt.u32.totalorder %s4589_s30, %s4899_s23 }
  0x84   : > { %p4597_p8 = por %p4596_p4, %p4595_p12 }
  0x85   : > { %p4593_p6 = pneg %p4592_p5 }
  0x86   : > { %p4599_p10 = por %p4598_p9, %p4597_p8 }
  0x88   : > { %p4600_p0 = pnand %p4599_p10, %p4593_p6 }
  0x8a   : > { %4603 = shalt.err (!%p4600_p0)
}
  0x8b   : > { %s4604_s19 = scalar_lea.vmem %s390_s14, 16  ;;  %s4747_s28 = smov [#allocation7]  }
  0x8c   : > { %p4605_p7 = scmp.ne.s32.totalorder %s390_s14, %s4604_s19  ;;  %s4609_s17 = sshll.u32 %s4747_s28, 4  ;;  %s4610_s17 = int_to_ptr.vmem [resolvable:$false] %s4609_s17 }
  0x8d   : > { %s4611_s0 = scalar_lea.vmem %s4610_s17, 32  ;;  %p4612_p11 = scmp.lt.s32.totalorder %s390_s14, %s4610_s17 }
  0x8e   : > { %p4607_p1 = pnand %p4605_p7, %p4909_p2  ;;  %p4613_p5 = scmp.lt.s32.totalorder %s4611_s0, %s4604_s19 }
  0x90   : > { %p4608_p3 = pneg %p4607_p1  ;;  %p4614_p13 = por %p4613_p5, %p4612_p11 }
  0x92   : > { %p4615_p4 = pnand %p4614_p13, %p4608_p3 }
  0x94   : > { %4618 = shalt.err (!%p4615_p4)
}
  0x95   : > { %p5866_p12 = scmp.ne.s32.totalorder %s5857_s27, 0  ;;  %s5027_s6 = scalar_lea.hbm %s5822_s7, %s3961_s3 }
  0x96   : > { %s425_s8 = scalar_lea.vmem [#allocation10], %s3552_s20  ;;  %s4619_s9 = scalar_lea.hbm %s5027_s6, 32768 }
  0x97   : > { %3984 = dma.hbm_to_vmem [thread:$0]  (!%p5866_p12), %s4899_s23, 16, %s390_s14, %s4903_s24  }
  0x98   : > { %s432_s29 = sshll.u32 %s425_s8, 4  ;;  %p4620_p13 = scmp.ne.s32.totalorder %s5027_s6, %s4619_s9  ;;  %s5031_s29 = int_to_ptr.vmem [resolvable:$true] %s432_s29 }
  0x99   : > { %s4624_s14 = scalar_lea.hbm %s5822_s7, 65536  ;;  %p4625_p9 = scmp.lt.u32.totalorder %s5027_s6, %s5822_s7 }
  0x9a   : > { %p4622_p6 = pnand %p4620_p13, %p4909_p2  ;;  %p4626_p10 = scmp.lt.u32.totalorder %s4624_s14, %s4619_s9 }
  0x9b   : > { %p4628_p7 = scmp.lt.u32.totalorder %s4619_s9, %s5027_s6 }
  0x9c   : > { %p4623_p8 = pneg %p4622_p6  ;;  %p4627_p0 = por %p4626_p10, %p4625_p9 }
  0x9e   : > { %p4629_p1 = por %p4628_p7, %p4627_p0 }
  0xa0   : > { %p4630_p3 = pnand %p4629_p1, %p4623_p8 }
  0xa2   : > { %4633 = shalt.err (!%p4630_p3)
}
  0xa3   : > { %s4634_s25 = scalar_lea.vmem %s5031_s29, 32768  ;;  %s4748_s20 = smov [#allocation10]  }
  0xa4   : > { %p4635_p11 = scmp.ne.s32.totalorder %s5031_s29, %s4634_s25  ;;  %s4639_s19 = sshll.u32 %s4748_s20, 4  ;;  %s4640_s19 = int_to_ptr.vmem [resolvable:$false] %s4639_s19 }
  0xa5   : > { %s4641_s28 = scalar_lea.vmem %s4640_s19, 65536  ;;  %p4642_p13 = scmp.lt.s32.totalorder %s5031_s29, %s4640_s19 }
  0xa6   : > { %p4637_p5 = pnand %p4635_p11, %p4909_p2  ;;  %p4643_p6 = scmp.lt.s32.totalorder %s4641_s28, %s4634_s25 }
  0xa8   : > { %p4638_p4 = pneg %p4637_p5  ;;  %p4644_p9 = por %p4643_p6, %p4642_p13 }
  0xaa   : > { %p4645_p10 = pnand %p4644_p9, %p4638_p4 }
  0xac   : > { %4648 = shalt.err (!%p4645_p10)
}
  0xad   : > { %3990 = dma.hbm_to_vmem [thread:$0]  (!%p5866_p12), %s5027_s6, 32768, %s5031_s29, %s4948_s16, %s4745_s11, %s4745_s11, %s4746_s22  }
  0xae   : > { %p5867_p2 = scmp.ne.s32.totalorder %s5861_s26, 0 }
  0xaf   : > { %s5061_s18 = sand.u32 (!%p5867_p2), 1, %s4723_s10   ;;  %p5868_p8 = scmp.ne.s32.totalorder (!%p5867_p2), %s5851_s21, 0 }
  0xb0   : > { %450 = sbr.rel (%p5867_p2) target bundleno = 1825 (0x721), region = 56  ;;  %s3556_s17 = sshll.u32 (!%p5867_p2), %s5061_s18, 5 }
  0xb1   : > { %s453_s0 = scalar_lea.sflag (!%p5867_p2), [#allocation3], %s5061_s18  ;;  %s5067_s27 = scalar_lea.vmem (!%p5867_p2), [#allocation2], %s3556_s17 }
  0xb7   : > { %4702 = dma.done.wait (%p5868_p8), %s453_s0, 512  }
  0xb8   : > { %4704 = vsyncadd (%p5868_p8), %s453_s0, 4294966784  ;;  %s461_s26 = sand.u32 1, %s4840_s15   ;;  %s464_s11 = scalar_lea.vmem [#allocation5], %s5061_s18 }
  0xb9   : > { %s462_s16 = scalar_lea.sflag [#allocation6], %s461_s26 }
  0xba   : > { %4706 = dma.done.wait (%p5868_p8), %s462_s16, 32  }
  0xbb   : > { %4708 = vsyncadd (%p5868_p8), %s462_s16, 4294967264  ;;  %s3557_s22 = sshll.u32 %s5061_s18, 1  ;;  %s472_s2 = scalar_lea.vmem [#allocation7], %s5061_s18 }
  0xbc   : > { %s478_s5 = scalar_lea.sflag [#allocation9], %s461_s26  ;;  %s5081_s6 = scalar_lea.vmem [#allocation8], %s3557_s22 }
  0xbd   : > { %4710 = dma.done.wait (%p5868_p8), %s478_s5, 32800  }
  0xbe   : > { %4712 = vsyncadd (%p5868_p8), %s478_s5, 4294934496  ;;  %vm589_vm0 = vcmask 1043456   ;;  %v5088_v0 = vld [vmem:[%s5067_s27 + $0x10] sm:$0xff]  ;;  %v5091_v1 = vld [vmem:[%s5067_s27 + $0x18] sm:$0xff]  ;;  %p558_p12 = scmp.lt.s32.totalorder %s4731_s12, 1  ;;  %v633_v36 = vlaneseq  ;;  %v4749_v47 = vmov 0  }
  0xbf   : > { %v5094_v2 = vld [vmem:[%s5067_s27] sm:$0xff]  ;;  %v583_v3 = vcombine.high %v5088_v0, %v5088_v0  ;;  %v584_v4 = vcombine.high %v5091_v1, %v5091_v1  ;;  %v599_v5 = vsel %vm589_vm0, %v5088_v0, -inf  ;;  %v601_v6 = vsel %vm589_vm0, %v5091_v1, -inf  ;;  %v5105_v7 = vld [vmem:[%s5067_s27 + $0x8] sm:$0xff]  ;;  %4057 = vset.pattern.permute.xlu0 %v4749_v47  ;;  %4058 = vset.pattern.permute.xlu1 %v4749_v47  ;;  %s5869_s14 = sld [smem:[#allocation24_spill]]  ;;  %s5870_s19 = sld [smem:[#allocation27_spill]] }
  0xc0   : > { %v602_v8 = vmax.f32 %v599_v5, %v601_v6  ;;  %v581_v9 = vcombine.high %v5094_v2, %v5094_v2  ;;  %v582_v10 = vcombine.high %v5105_v7, %v5105_v7  ;;  %v590_v11 = vsel %vm589_vm0, %v5094_v2, -inf  ;;  %s5133_s15 = scalar_select %p558_p12, %s4731_s12, 1 }
  0xc1   : > { %v600_v12 = vsel %vm589_vm0, %v583_v3, -inf  ;;  %v603_v13 = vsel %vm589_vm0, %v584_v4, -inf  ;;  %v592_v14 = vsel %vm589_vm0, %v5105_v7, -inf  ;;  %v617_v15 = vsel %vm589_vm0, %v5088_v0, 0.0  ;;  %s3558_s0 = sshll.u32 %s5061_s18, 11  ;;  %s5871_s22 = sld [smem:[#allocation28_spill]] }
  0xc2   : > { %v604_v16 = vmax.f32 %v600_v12, %v603_v13  ;;  %v591_v17 = vsel %vm589_vm0, %v581_v9, -inf  ;;  %v593_v18 = vmax.f32 %v590_v11, %v592_v14  ;;  %v594_v19 = vsel %vm589_vm0, %v582_v10, -inf  ;;  %s3560_s21 = sshll.u32 %s5133_s15, 2  ;;  %s3561_s30 = sshll.u32 %s5133_s15, 1 }
  0xc3   : > { %v595_v20 = vmax.f32 %v591_v17, %v594_v19  ;;  %v618_v21 = vsel %vm589_vm0, %v583_v3, 0.0  ;;  %v620_v22 = vsel %vm589_vm0, %v5091_v1, 0.0  ;;  %v608_v25 = vsel %vm589_vm0, %v5094_v2, 0.0  ;;  %s561_s9 = scalar_lea.vmem %s5816_s1, %s3560_s21  ;;  %s5367_s26 = scalar_lea.vmem [#allocation10], %s3558_s0 }
  0xc4   : > { %v605_v23 = vmax.f32 %v602_v8, %v604_v16  ;;  %v619_v24 = vadd.f32 %v618_v21, %v617_v15  ;;  %v609_v26 = vsel %vm589_vm0, %v581_v9, 0.0  ;;  %v622_v28 = vsel %vm589_vm0, %v584_v4, 0.0  ;;  %v631_v39 = vld [vmem:[%s561_s9] sm:$0xf]  ;;  %s3962_s5 = sshll.u32 %s4731_s12, 8  ;;  %s5872_s29 = sld [smem:[#allocation29_spill]] }
  0xc5   : > { %v596_v27 = vmax.f32 %v593_v18, %v595_v20  ;;  %v610_v29 = vadd.f32 %v609_v26, %v608_v25  ;;  %v611_v30 = vsel %vm589_vm0, %v5105_v7, 0.0  ;;  %v613_v32 = vsel %vm589_vm0, %v582_v10, 0.0  ;;  %s564_s3 = scalar_lea.vmem %s5869_s14, %s5133_s15  ;;  %s568_s28 = scalar_lea.vmem %s5870_s19, %s3561_s30 }
  0xc6   : > { %606 = vmax.xlane.f32.xlu0 %v605_v23  ;;  %v621_v31 = vadd.f32 %v620_v22, %v619_v24  ;;  %v5136_v37 = vshrl.u32 %v633_v36, 7  ;;  %vm653_vm1 = vcmask 1041409   ;;  %v3562_v60 = vld [vmem:[%s564_s3] ss:$0 sm:$0xff]  ;;  %v777_v24 = vld [vmem:[%s5081_s6] sm:$0x3] }
  0xc7   : > { %597 = vmax.xlane.f32.xlu1 %v596_v27  ;;  %v612_v33 = vadd.f32 %v611_v30, %v610_v29  ;;  %v778_v25 = vld [vmem:[%s568_s28] sm:$0x3]  ;;  %v4750_v26 = vmov 2   ;;  %v4751_v27 = vmov 1   ;;  %vm1157_vm2 = vcmask 1041408   ;;  %s556_s6 = scalar_lea.vmem [#allocation11], %s3556_s17 }
  0xc8   : > { %v623_v34 = vadd.f32 %v622_v28, %v621_v31  ;;  %v5142_v38 = vsub.s32 1, %v5136_v37  ;;  %v5145_v40 = vsub.s32 0, %v5136_v37  ;;  %v5149_v42 = vsub.s32 2, %v5136_v37  ;;  %v3563_v28 = vld [vmem:[%s464_s11] ss:$0 sm:$0xff]  ;;  %s5873_s12 = sld [smem:[#allocation20_spill]] }
  0xc9   : > { %v614_v35 = vadd.f32 %v613_v32, %v612_v33  ;;  %v5154_v45 = vsub.s32 3, %v5136_v37  ;;  %v3564_v29 = vld [vmem:[%s472_s2] ss:$0 sm:$0xff]  ;;  %s571_s2 = scalar_lea.vmem %s5871_s22, %s5133_s15  ;;  %s3332_s15 = sshll.u32 %s556_s6, 4  ;;  %s5764_s15 = int_to_ptr.vmem [resolvable:$true] %s3332_s15 }
  0xca   : > { %624 = vadd.xlane.f32.xlu0 %v623_v34  ;;  %v660_v41 = vrot.slane %v631_v39, %v5142_v38  ;;  %v636_v43 = vrot.slane %v631_v39, %v5145_v40  ;;  %v678_v44 = vrot.slane %v631_v39, %v5149_v42  ;;  %s5760_s9 = scalar_lea.hbm %s5872_s29, %s3962_s5  ;;  %s3316_s17 = scalar_lea.sflag [#allocation4], %s5061_s18 }
  0xcb   : > { %615 = vadd.xlane.f32.xlu1 %v614_v35  ;;  %v697_v46 = vrot.slane %v631_v39, %v5154_v45  ;;  %s4649_s23 = scalar_lea.vmem %s5764_s15, 512  ;;  %s4755_s24 = smov [#allocation11]  }
  0xcc   : > { %p4650_p0 = scmp.ne.s32.totalorder %s5764_s15, %s4649_s23  ;;  %s4653_s14 = sshll.u32 %s4755_s24, 4  ;;  %s4654_s14 = int_to_ptr.vmem [resolvable:$false] %s4653_s14 }
  0xcd   : > { %s4655_s3 = scalar_lea.vmem %s4654_s14, 1024  ;;  %p4656_p11 = scmp.lt.s32.totalorder %s5764_s15, %s4654_s14 }
  0xce   : > { %p5874_p7 = scmp.ne.s32.totalorder %s5873_s12, 0  ;;  %p4657_p5 = scmp.lt.s32.totalorder %s4655_s3, %s4649_s23 }
  0xd0   : > { %p4651_p1 = pnand %p4650_p0, %p5874_p7  ;;  %p4658_p4 = por %p4657_p5, %p4656_p11 }
  0xd2   : > { %p4652_p3 = pneg %p4651_p1 }
  0xd4   : > { %p4659_p13 = pnand %p4658_p4, %p4652_p3 }
  0xdc   : > { %664 = vbcast.lane.b32.xlu1 %v660_v41, 511 }
  0xe0   : > { %639 = vbcast.lane.b32.xlu0 %v636_v43, 256  ;;  %682 = vbcast.lane.b32.xlu1 %v678_v44, 510  ;;  %v4752_v43 = vmov 3  }
  0xe4   : > { %701 = vbcast.lane.b32.xlu1 %v697_v46, 509  ;;  %v4753_v46 = vmov 839922192  }
  0xe8   : > { %781 = vperm.xlu1 %4058, %v777_v24  }
  0xec   : > { %870 = vperm.xlu1 %4058, %v778_v25  }
  0xf0   : > { %4060 = vset.pattern.permute.xlu1 %v4750_v26 }
 0x153   : > { %v607_v48 = vpop.xlane.xlu0 %606 }
 0x154   : > { %v598_v49 = vpop.xlane.xlu1 %597 }
 0x157   : > { %v625_v50 = vpop.xlane.xlu0 %624 }
 0x158   : > { %v628_v51 = vmul.f32 0.001953125, %v625_v50  ;;  %v616_v52 = vpop.xlane.xlu1 %615 }
 0x159   : > { %v627_v53 = vmul.f32 0.001953125, %v616_v52 }
 0x15a   : > { %v630_v54 = vadd.f32 %v628_v51, %v607_v48  ;;  %v758_v48 = vunpack.c.l.s4 %v4753_v46 }
 0x15b   : > { %v629_v55 = vadd.f32 %v627_v53, %v598_v49  ;;  %v640_v56 = vpop.permute.xlu0 %639 }
 0x15c   : > { %v643_v57 = vmul.f32 %v640_v56, %v630_v54  ;;  %v665_v58 = vpop.permute.xlu1 %664  ;;  %v759_v49 = vunpack.c.0.s8 %v758_v48 }
 0x15d   : > { %v667_v59 = vmul.f32 %v665_v58, %v629_v55  ;;  %v642_v61 = vmul.f32 %v640_v56, %v629_v55  ;;  %v668_v6 = vmul.f32 %v665_v58, %v630_v54  ;;  %v794_v56 = vsub.s32 4, %v5136_v37 }
 0x15e   : > { %v652_v62 = vrot.slane %v643_v57, 7  ;;  %v762_v51 = vsub.s32 %v759_v49, %v5136_v37  ;;  %v5186_v57 = vsub.s32 5, %v5136_v37 }
 0x15f   : > { %v671_v63 = vrot.slane %v667_v59, 1 }
 0x160   : > { %v654_v3 = vsel %vm653_vm1, %v652_v62, %v642_v61  ;;  %v683_v4 = vpop.permute.xlu1 %682  ;;  %v5201_v61 = vsub.s32 6, %v5136_v37  ;;  %v5204_v62 = vsub.s32 7, %v5136_v37 }
 0x161   : > { %v656_v5 = vadd.f32 %v3562_v60, %v654_v3  ;;  %v685_v8 = vmul.f32 %v683_v4, %v629_v55  ;;  %v686_v9 = vmul.f32 %v683_v4, %v630_v54  ;;  %v672_v10 = vsel %vm653_vm1, %v668_v6, %v671_v63 }
 0x163   : > { %v689_v11 = vrot.slane %v685_v8, 2  ;;  %v690_v12 = vrot.slane %v686_v9, 1  ;;  %v674_v13 = vadd.f32 %v672_v10, %v656_v5 }
 0x164   : > { %v702_v14 = vpop.permute.xlu1 %701 }
 0x165   : > { %v691_v15 = vsel %vm653_vm1, %v690_v12, %v689_v11  ;;  %v704_v16 = vmul.f32 %v702_v14, %v629_v55  ;;  %v705_v17 = vmul.f32 %v702_v14, %v630_v54 }
 0x166   : > { %v693_v20 = vadd.f32 %v691_v15, %v674_v13 }
 0x167   : > { %v708_v18 = vrot.slane %v704_v16, 3  ;;  %v709_v19 = vrot.slane %v705_v17, 2 }
 0x168   : > { %v5179_v44 = vpop.permute.xlu1 %781 }
 0x169   : > { %v710_v21 = vsel %vm653_vm1, %v709_v19, %v708_v18 }
 0x16a   : > { %v712_v22 = vadd.f32 %v710_v21, %v693_v20 }
 0x16c   : > { %4451 = vtanh.f32 %v712_v22  ;;  %v5181_v50 = vpop.permute.xlu1 %870 }
 0x176   : > { %v4452_v23 = vpop.eup %4451 }
 0x177   : > { %718 = vperm.xlu0 %4057, %v4452_v23  }
 0x17b   : > { %4059 = vset.pattern.permute.xlu0 %v4751_v27 }
 0x1f6   : > { %v719_v30 = vpop.permute.xlu0 %718 }
 0x1f7   : > { %v727_v31 = vmul.f32 %v3563_v28, %v719_v30 }
 0x1f9   : > { %v734_v32 = vadd.f32 %v3564_v29, %v727_v31 }
 0x1fb   : > { %v3565_v33 = vmul.f32 -1.442695, %v734_v32 }
 0x1fd   : > { %4453 = vpow2.f32 %v3565_v33 }
 0x207   : > { %v4454_v34 = vpop.eup %4453 }
 0x208   : > { %v738_v35 = vadd.f32 1.0, %v4454_v34 }
 0x20a   : > { %4455 = vrcp.f32 %v738_v35 }
 0x214   : > { %v4456_v36 = vpop.eup %4455 }
 0x215   : > { %v751_v39 = vrot.slane %v4456_v36, %v5142_v38  ;;  %v744_v41 = vrot.slane %v4456_v36, %v5145_v40 }
 0x217   : > { %753 = vbcast.lane.b32.xlu0 %v751_v39, 256  ;;  %746 = vbcast.lane.b32.xlu1 %v744_v41, 256 }
 0x21b   : > { %882 = vperm.xlu0 %4059, %v777_v24   ;;  %974 = vperm.xlu1 %4060, %v777_v24  }
 0x21f   : > { %4061 = vset.pattern.permute.xlu1 %v4752_v43  ;;  %4062 = vset.pattern.permute.xlu0 %v4749_v47 }
 0x220   : > { %1066 = vperm.xlu1 %4061, %v777_v24  }
 0x289   : > { %v754_v52 = vpop.permute.xlu0 %753  ;;  %v747_v53 = vpop.permute.xlu1 %746 }
 0x28a   : > { %v770_v54 = vrot.slane %v754_v52, %v762_v51  ;;  %v763_v55 = vrot.slane %v747_v53, %v762_v51 }
 0x28c   : > { %v5189_v47 = vmul.f32 %v770_v54, %v5088_v0  ;;  %v5192_v58 = vmul.f32 %v770_v54, %v5091_v1  ;;  %v5195_v59 = vmul.f32 %v763_v55, %v5094_v2  ;;  %v5198_v60 = vmul.f32 %v763_v55, %v5105_v7 }
 0x28e   : > { %v807_v63 = vrot.slane %v5189_v47, %v5145_v40  ;;  %v811_v0 = vrot.slane %v5189_v47, %v794_v56  ;;  %v815_v1 = vrot.slane %v5192_v58, %v5145_v40  ;;  %v819_v2 = vrot.slane %v5192_v58, %v794_v56 }
 0x28f   : > { %v904_v7 = vrot.slane %v5189_v47, %v5142_v38  ;;  %v908_v3 = vrot.slane %v5189_v47, %v5186_v57  ;;  %v912_v4 = vrot.slane %v5192_v58, %v5142_v38  ;;  %v916_v5 = vrot.slane %v5192_v58, %v5186_v57 }
 0x290   : > { %v847_v6 = vrot.slane %v807_v63, %v5145_v40  ;;  %v851_v8 = vrot.slane %v811_v0, %v5145_v40  ;;  %v855_v9 = vrot.slane %v815_v1, %v5145_v40  ;;  %v859_v10 = vrot.slane %v819_v2, %v5145_v40 }
 0x291   : > { %v944_v11 = vrot.slane %v904_v7, %v5142_v38  ;;  %v948_v12 = vrot.slane %v908_v3, %v5142_v38  ;;  %v952_v13 = vrot.slane %v912_v4, %v5142_v38  ;;  %v956_v14 = vrot.slane %v916_v5, %v5142_v38 }
 0x292   : > { %v864_v15 = vmul.f32 %v847_v6, %v5179_v44  ;;  %v865_v16 = vmul.f32 %v851_v8, %v5179_v44  ;;  %v866_v17 = vmul.f32 %v855_v9, %v5179_v44  ;;  %v867_v18 = vmul.f32 %v859_v10, %v5179_v44 }
 0x293   : > { %v996_v19 = vrot.slane %v5189_v47, %v5149_v42  ;;  %v1000_v20 = vrot.slane %v5189_v47, %v5201_v61  ;;  %v1004_v21 = vrot.slane %v5192_v58, %v5149_v42  ;;  %v1008_v22 = vrot.slane %v5192_v58, %v5201_v61 }
 0x294   : > { %v877_v23 = vadd.f32 %v5181_v50, %v864_v15  ;;  %v878_v24 = vadd.f32 %v5181_v50, %v865_v16  ;;  %v879_v25 = vadd.f32 %v5181_v50, %v866_v17  ;;  %v880_v26 = vadd.f32 %v5181_v50, %v867_v18 }
 0x295   : > { %v1036_v27 = vrot.slane %v996_v19, %v5149_v42  ;;  %v1040_v28 = vrot.slane %v1000_v20, %v5149_v42  ;;  %v1044_v29 = vrot.slane %v1004_v21, %v5149_v42  ;;  %v1048_v30 = vrot.slane %v1008_v22, %v5149_v42 }
 0x296   : > { %v1088_v31 = vrot.slane %v5189_v47, %v5154_v45  ;;  %v1092_v32 = vrot.slane %v5189_v47, %v5204_v62  ;;  %v1096_v33 = vrot.slane %v5192_v58, %v5154_v45  ;;  %v1100_v34 = vrot.slane %v5192_v58, %v5204_v62 }
 0x297   : > { %v791_v35 = vrot.slane %v5195_v59, %v5145_v40  ;;  %v795_v36 = vrot.slane %v5195_v59, %v794_v56  ;;  %v799_v39 = vrot.slane %v5198_v60, %v5145_v40  ;;  %v803_v41 = vrot.slane %v5198_v60, %v794_v56 }
 0x298   : > { %v1128_v43 = vrot.slane %v1088_v31, %v5154_v45  ;;  %v1132_v46 = vrot.slane %v1092_v32, %v5154_v45  ;;  %v1136_v48 = vrot.slane %v1096_v33, %v5154_v45  ;;  %v1140_v49 = vrot.slane %v1100_v34, %v5154_v45 }
 0x299   : > { %v831_v51 = vrot.slane %v791_v35, %v5145_v40  ;;  %v835_v52 = vrot.slane %v795_v36, %v5145_v40  ;;  %v839_v53 = vrot.slane %v799_v39, %v5145_v40  ;;  %v843_v54 = vrot.slane %v803_v41, %v5145_v40 }
 0x29a   : > { %v883_v55 = vpop.permute.xlu0 %882  ;;  %v5270_v63 = vpop.permute.xlu1 %974  ;;  %v888_v56 = vrot.slane %v5195_v59, %v5142_v38  ;;  %v892_v0 = vrot.slane %v5195_v59, %v5186_v57  ;;  %v896_v1 = vrot.slane %v5198_v60, %v5142_v38  ;;  %v900_v2 = vrot.slane %v5198_v60, %v5186_v57 }
 0x29b   : > { %v961_v7 = vmul.f32 %v944_v11, %v883_v55  ;;  %v962_v3 = vmul.f32 %v948_v12, %v883_v55  ;;  %v963_v4 = vmul.f32 %v952_v13, %v883_v55  ;;  %v964_v5 = vmul.f32 %v956_v14, %v883_v55 }
 0x29c   : > { %v1053_v6 = vmul.f32 %v1036_v27, %v5270_v63  ;;  %v1054_v8 = vmul.f32 %v1040_v28, %v5270_v63  ;;  %v1055_v9 = vmul.f32 %v1044_v29, %v5270_v63  ;;  %v1056_v10 = vmul.f32 %v1048_v30, %v5270_v63 }
 0x29d   : > { %v969_v15 = vadd.f32 %v961_v7, %v877_v23  ;;  %v970_v16 = vadd.f32 %v962_v3, %v878_v24  ;;  %v971_v17 = vadd.f32 %v963_v4, %v879_v25  ;;  %v972_v18 = vadd.f32 %v964_v5, %v880_v26 }
 0x29e   : > { %v860_v19 = vmul.f32 %v831_v51, %v5179_v44  ;;  %v861_v57 = vmul.f32 %v835_v52, %v5179_v44  ;;  %v862_v11 = vmul.f32 %v839_v53, %v5179_v44  ;;  %v863_v12 = vmul.f32 %v843_v54, %v5179_v44 }
 0x29f   : > { %v5288_v13 = vpop.permute.xlu1 %1066  ;;  %v1061_v14 = vadd.f32 %v1053_v6, %v969_v15  ;;  %v1062_v20 = vadd.f32 %v1054_v8, %v970_v16  ;;  %v1063_v21 = vadd.f32 %v1055_v9, %v971_v17  ;;  %v1064_v22 = vadd.f32 %v1056_v10, %v972_v18 }
 0x2a0   : > { %v1145_v27 = vmul.f32 %v1128_v43, %v5288_v13  ;;  %v1146_v23 = vmul.f32 %v1132_v46, %v5288_v13  ;;  %v1147_v24 = vmul.f32 %v1136_v48, %v5288_v13  ;;  %v1148_v25 = vmul.f32 %v1140_v49, %v5288_v13 }
 0x2a1   : > { %v873_v26 = vadd.f32 %v5181_v50, %v860_v19  ;;  %v874_v28 = vadd.f32 %v5181_v50, %v861_v57  ;;  %v875_v44 = vadd.f32 %v5181_v50, %v862_v11  ;;  %v876_v29 = vadd.f32 %v5181_v50, %v863_v12 }
 0x2a2   : > { %v5298_v30 = vadd.f32 %v1145_v27, %v1061_v14  ;;  %v5300_v31 = vadd.f32 %v1146_v23, %v1062_v20  ;;  %v5302_v32 = vadd.f32 %v1147_v24, %v1063_v21  ;;  %v5304_v33 = vadd.f32 %v1148_v25, %v1064_v22 }
 0x2a3   : > { %v928_v34 = vrot.slane %v888_v56, %v5142_v38  ;;  %v932_v35 = vrot.slane %v892_v0, %v5142_v38  ;;  %v936_v36 = vrot.slane %v896_v1, %v5142_v38  ;;  %v940_v39 = vrot.slane %v900_v2, %v5142_v38 }
 0x2a4   : > { %v1167_v41 = vsel %vm1157_vm2, %v5298_v30, 0.0  ;;  %v1168_v50 = vsel %vm1157_vm2, %v5300_v31, 0.0  ;;  %v1170_v43 = vsel %vm1157_vm2, %v5302_v32, 0.0  ;;  %v1172_v46 = vsel %vm1157_vm2, %v5304_v33, 0.0 }
 0x2a5   : > { %v1169_v48 = vadd.f32 %v1168_v50, %v1167_v41  ;;  %v957_v49 = vmul.f32 %v928_v34, %v883_v55  ;;  %v958_v51 = vmul.f32 %v932_v35, %v883_v55  ;;  %v959_v52 = vmul.f32 %v936_v36, %v883_v55 }
 0x2a6   : > { %v960_v53 = vmul.f32 %v940_v39, %v883_v55  ;;  %v980_v54 = vrot.slane %v5195_v59, %v5149_v42  ;;  %v984_v56 = vrot.slane %v5195_v59, %v5201_v61  ;;  %v988_v0 = vrot.slane %v5198_v60, %v5149_v42 }
 0x2a7   : > { %v1171_v1 = vadd.f32 %v1170_v43, %v1169_v48  ;;  %v965_v2 = vadd.f32 %v957_v49, %v873_v26  ;;  %v966_v7 = vadd.f32 %v958_v51, %v874_v28  ;;  %v967_v3 = vadd.f32 %v959_v52, %v875_v44  ;;  %v4069_v48 = vld [vmem:[%s5367_s26 + $0x604] ss:$16 sps:$4 sm:$0xff]   ;;  %v4071_v49 = vld [vmem:[%s5367_s26 + $0x400] ss:$16 sps:$4 sm:$0xff]  }
 0x2a8   : > { %v968_v4 = vadd.f32 %v960_v53, %v876_v29  ;;  %v992_v5 = vrot.slane %v5198_v60, %v5201_v61  ;;  %v1020_v6 = vrot.slane %v980_v54, %v5149_v42  ;;  %v1024_v55 = vrot.slane %v984_v56, %v5149_v42  ;;  %v4072_v51 = vld [vmem:[%s5367_s26 + $0x600] ss:$16 sps:$4 sm:$0xff]   ;;  %2212 = vmatprep.subr.bf16.mxu1 %v4069_v48  ;;  %v4073_v52 = vld [vmem:[%s5367_s26 + $0x424] ss:$16 sps:$4 sm:$0xff]  }
 0x2a9   : > { %v1173_v8 = vadd.f32 %v1172_v46, %v1171_v1  ;;  %v1028_v9 = vrot.slane %v988_v0, %v5149_v42  ;;  %v1072_v10 = vrot.slane %v5195_v59, %v5154_v45  ;;  %v1076_v15 = vrot.slane %v5195_v59, %v5204_v62  ;;  %v4067_v46 = vld [vmem:[%s5367_s26 + $0x404] ss:$16 sps:$4 sm:$0xff]   ;;  %2213 = vmatpush1.bf16.msra.mxu1 %v4072_v51  ;;  %v4077_v54 = vld [vmem:[%s5367_s26 + $0x420] ss:$16 sps:$4 sm:$0xff]  }
 0x2aa   : > { %v1032_v16 = vrot.slane %v992_v5, %v5149_v42  ;;  %v1049_v17 = vmul.f32 %v1020_v6, %v5270_v63  ;;  %v1050_v18 = vmul.f32 %v1024_v55, %v5270_v63  ;;  %v1080_v61 = vrot.slane %v5198_v60, %v5154_v45  ;;  %2171 = vmatprep.subr.bf16.mxu0 %v4067_v46  ;;  %v4075_v53 = vld [vmem:[%s5367_s26 + $0x624] ss:$16 sps:$4 sm:$0xff]   ;;  %v4078_v56 = vld [vmem:[%s5367_s26 + $0x620] ss:$16 sps:$4 sm:$0xff]  }
 0x2ab   : > { %1174 = vadd.xlane.f32.xlu1 %v1173_v8  ;;  %v1051_v19 = vmul.f32 %v1028_v9, %v5270_v63  ;;  %v1084_v57 = vrot.slane %v5198_v60, %v5204_v62  ;;  %v1112_v11 = vrot.slane %v1072_v10, %v5154_v45  ;;  %v1116_v12 = vrot.slane %v1076_v15, %v5154_v45  ;;  %v4079_v0 = vld [vmem:[%s5367_s26 + $0x444] ss:$16 sps:$4 sm:$0xff]   ;;  %v4089_v5 = vld [vmem:[%s5367_s26 + $0x460] ss:$16 sps:$4 sm:$0xff]  }
 0x2ac   : > { %v1052_v14 = vmul.f32 %v1032_v16, %v5270_v63  ;;  %v1057_v20 = vadd.f32 %v1049_v17, %v965_v2  ;;  %v1058_v21 = vadd.f32 %v1050_v18, %v966_v7  ;;  %v1120_v22 = vrot.slane %v1080_v61, %v5154_v45  ;;  %2172 = vmatpush1.bf16.msra.mxu0 %v4071_v49  ;;  %v4081_v1 = vld [vmem:[%s5367_s26 + $0x644] ss:$16 sps:$4 sm:$0xff]   ;;  %v4083_v2 = vld [vmem:[%s5367_s26 + $0x440] ss:$16 sps:$4 sm:$0xff]  }
 0x2ad   : > { %v1059_v27 = vadd.f32 %v1051_v19, %v967_v3  ;;  %v1124_v23 = vrot.slane %v1084_v57, %v5154_v45  ;;  %v1141_v24 = vmul.f32 %v1112_v11, %v5288_v13  ;;  %v1142_v25 = vmul.f32 %v1116_v12, %v5288_v13  ;;  %2173 = vmatprep.subr.bf16.mxu0 %v4073_v52  ;;  %v4084_v7 = vld [vmem:[%s5367_s26 + $0x640] ss:$16 sps:$4 sm:$0xff]   ;;  %v4085_v3 = vld [vmem:[%s5367_s26 + $0x464] ss:$16 sps:$4 sm:$0xff]  }
 0x2ae   : > { %v1060_v26 = vadd.f32 %v1052_v14, %v968_v4  ;;  %v1143_v62 = vmul.f32 %v1120_v22, %v5288_v13  ;;  %2214 = vmatprep.subr.bf16.mxu1 %v4075_v53  ;;  %v4087_v4 = vld [vmem:[%s5367_s26 + $0x664] ss:$16 sps:$4 sm:$0xff]   ;;  %v4090_v6 = vld [vmem:[%s5367_s26 + $0x660] ss:$16 sps:$4 sm:$0xff]  }
 0x2af   : > { %v1144_v28 = vmul.f32 %v1124_v23, %v5288_v13  ;;  %v5350_v44 = vadd.f32 %v1141_v24, %v1057_v20  ;;  %v5352_v63 = vadd.f32 %v1142_v25, %v1058_v21  ;;  %2215 = vmatpush1.bf16.msra.mxu1 %v4078_v56  ;;  %v4091_v55 = vld [vmem:[%s5367_s26 + $0x484] ss:$16 sps:$4 sm:$0xff]   ;;  %v4095_v9 = vld [vmem:[%s5367_s26 + $0x480] ss:$16 sps:$4 sm:$0xff]  }
 0x2b0   : > { %v5354_v29 = vadd.f32 %v1143_v62, %v1059_v27  ;;  %2174 = vmatpush1.bf16.msra.mxu0 %v4077_v54  ;;  %2216 = vmatprep.subr.bf16.mxu1 %v4081_v1  ;;  %v4093_v8 = vld [vmem:[%s5367_s26 + $0x684] ss:$16 sps:$4 sm:$0xff]   ;;  %v4096_v10 = vld [vmem:[%s5367_s26 + $0x680] ss:$16 sps:$4 sm:$0xff]  }
 0x2b1   : > { %v5356_v34 = vadd.f32 %v1144_v28, %v1060_v26  ;;  %v1158_v35 = vsel %vm1157_vm2, %v5350_v44, 0.0  ;;  %v1159_v36 = vsel %vm1157_vm2, %v5352_v63, 0.0  ;;  %2175 = vmatprep.subr.bf16.mxu0 %v4079_v0  ;;  %v4097_v15 = vld [vmem:[%s5367_s26 + $0x4a4] ss:$16 sps:$4 sm:$0xff]   ;;  %v4101_v17 = vld [vmem:[%s5367_s26 + $0x4a0] ss:$16 sps:$4 sm:$0xff]  }
 0x2b2   : > { %v1160_v39 = vadd.f32 %v1159_v36, %v1158_v35  ;;  %v1161_v41 = vsel %vm1157_vm2, %v5354_v29, 0.0  ;;  %v4099_v16 = vld [vmem:[%s5367_s26 + $0x6a4] ss:$16 sps:$4 sm:$0xff]   ;;  %v4102_v18 = vld [vmem:[%s5367_s26 + $0x6a0] ss:$16 sps:$4 sm:$0xff]  }
 0x2b3   : > { %v1163_v13 = vsel %vm1157_vm2, %v5356_v34, 0.0  ;;  %2217 = vmatpush1.bf16.msra.mxu1 %v4084_v7  ;;  %v4103_v61 = vld [vmem:[%s5367_s26 + $0x4c4] ss:$16 sps:$4 sm:$0xff]   ;;  %v4107_v53 = vld [vmem:[%s5367_s26 + $0x4c0] ss:$16 sps:$4 sm:$0xff]  }
 0x2b4   : > { %v1162_v50 = vadd.f32 %v1161_v41, %v1160_v39  ;;  %2176 = vmatpush1.bf16.msra.mxu0 %v4083_v2  ;;  %2218 = vmatprep.subr.bf16.mxu1 %v4087_v4  ;;  %v4105_v19 = vld [vmem:[%s5367_s26 + $0x6c4] ss:$16 sps:$4 sm:$0xff]   ;;  %v4108_v54 = vld [vmem:[%s5367_s26 + $0x6c0] ss:$16 sps:$4 sm:$0xff]  }
 0x2b5   : > { %2177 = vmatprep.subr.bf16.mxu0 %v4085_v3  ;;  %v4109_v56 = vld [vmem:[%s5367_s26 + $0x4e4] ss:$16 sps:$4 sm:$0xff]   ;;  %v4113_v1 = vld [vmem:[%s5367_s26 + $0x4e0] ss:$16 sps:$4 sm:$0xff]  }
 0x2b6   : > { %v1164_v43 = vadd.f32 %v1163_v13, %v1162_v50  ;;  %v4111_v0 = vld [vmem:[%s5367_s26 + $0x6e4] ss:$16 sps:$4 sm:$0xff]   ;;  %v4114_v2 = vld [vmem:[%s5367_s26 + $0x6e0] ss:$16 sps:$4 sm:$0xff]  }
 0x2b7   : > { %2219 = vmatpush1.bf16.msra.mxu1 %v4090_v6  ;;  %v4115_v7 = vld [vmem:[%s5367_s26 + $0x504] ss:$16 sps:$4 sm:$0xff]   ;;  %v4119_v4 = vld [vmem:[%s5367_s26 + $0x500] ss:$16 sps:$4 sm:$0xff]  }
 0x2b8   : > { %1165 = vadd.xlane.f32.xlu0 %v1164_v43  ;;  %2178 = vmatpush1.bf16.msra.mxu0 %v4089_v5  ;;  %v4117_v3 = vld [vmem:[%s5367_s26 + $0x704] ss:$16 sps:$4 sm:$0xff]   ;;  %v4120_v5 = vld [vmem:[%s5367_s26 + $0x700] ss:$16 sps:$4 sm:$0xff]  }
 0x2b9   : > { %2179 = vmatprep.subr.bf16.mxu0 %v4091_v55  ;;  %2220 = vmatprep.subr.bf16.mxu1 %v4093_v8  ;;  %v4121_v6 = vld [vmem:[%s5367_s26 + $0x524] ss:$16 sps:$4 sm:$0xff]   ;;  %v4125_v8 = vld [vmem:[%s5367_s26 + $0x520] ss:$16 sps:$4 sm:$0xff]  }
 0x2ba   : > { %v4123_v55 = vld [vmem:[%s5367_s26 + $0x724] ss:$16 sps:$4 sm:$0xff]  }
 0x2bb   : > { %2221 = vmatpush1.bf16.msra.mxu1 %v4096_v10  ;;  %v4127_v10 = vld [vmem:[%s5367_s26 + $0x544] ss:$16 sps:$4 sm:$0xff]  }
 0x2bc   : > { %2180 = vmatpush1.bf16.msra.mxu0 %v4095_v9  ;;  %2222 = vmatprep.subr.bf16.mxu1 %v4099_v16  ;;  %v4126_v9 = vld [vmem:[%s5367_s26 + $0x720] ss:$16 sps:$4 sm:$0xff]  }
 0x2bd   : > { %2181 = vmatprep.subr.bf16.mxu0 %v4097_v15  ;;  %v4129_v15 = vld [vmem:[%s5367_s26 + $0x744] ss:$16 sps:$4 sm:$0xff]   ;;  %v4131_v16 = vld [vmem:[%s5367_s26 + $0x540] ss:$16 sps:$4 sm:$0xff]  }
 0x2bf   : > { %2223 = vmatpush1.bf16.msra.mxu1 %v4102_v18  ;;  %v4133_v18 = vld [vmem:[%s5367_s26 + $0x564] ss:$16 sps:$4 sm:$0xff]  }
 0x2c0   : > { %2182 = vmatpush1.bf16.msra.mxu0 %v4101_v17  ;;  %2224 = vmatprep.subr.bf16.mxu1 %v4105_v19  ;;  %v4132_v17 = vld [vmem:[%s5367_s26 + $0x740] ss:$16 sps:$4 sm:$0xff]  }
 0x2c1   : > { %2183 = vmatprep.subr.bf16.mxu0 %v4103_v61  ;;  %v4135_v61 = vld [vmem:[%s5367_s26 + $0x764] ss:$16 sps:$4 sm:$0xff]   ;;  %v4137_v19 = vld [vmem:[%s5367_s26 + $0x560] ss:$16 sps:$4 sm:$0xff]  }
 0x2c3   : > { %2225 = vmatpush1.bf16.msra.mxu1 %v4108_v54 }
 0x2c4   : > { %2184 = vmatpush1.bf16.msra.mxu0 %v4107_v53  ;;  %2226 = vmatprep.subr.bf16.mxu1 %v4111_v0 }
 0x2c5   : > { %2185 = vmatprep.subr.bf16.mxu0 %v4109_v56 }
 0x2c7   : > { %2227 = vmatpush1.bf16.msra.mxu1 %v4114_v2 }
 0x2c8   : > { %2186 = vmatpush1.bf16.msra.mxu0 %v4113_v1  ;;  %2228 = vmatprep.subr.bf16.mxu1 %v4117_v3 }
 0x2c9   : > { %2187 = vmatprep.subr.bf16.mxu0 %v4115_v7 }
 0x2cb   : > { %2229 = vmatpush1.bf16.msra.mxu1 %v4120_v5 }
 0x2cc   : > { %2188 = vmatpush1.bf16.msra.mxu0 %v4119_v4  ;;  %2230 = vmatprep.subr.bf16.mxu1 %v4123_v55 }
 0x2cd   : > { %2189 = vmatprep.subr.bf16.mxu0 %v4121_v6 }
 0x2cf   : > { %2231 = vmatpush1.bf16.msra.mxu1 %v4126_v9 }
 0x2d0   : > { %2190 = vmatpush1.bf16.msra.mxu0 %v4125_v8  ;;  %2232 = vmatprep.subr.bf16.mxu1 %v4129_v15 }
 0x2d1   : > { %2191 = vmatprep.subr.bf16.mxu0 %v4127_v10 }
 0x2d3   : > { %2233 = vmatpush1.bf16.msra.mxu1 %v4132_v17 }
 0x2d4   : > { %2192 = vmatpush1.bf16.msra.mxu0 %v4131_v16  ;;  %2234 = vmatprep.subr.bf16.mxu1 %v4135_v61 }
 0x2d5   : > { %2193 = vmatprep.subr.bf16.mxu0 %v4133_v18 }
 0x2d8   : > { %2194 = vmatpush1.bf16.msra.mxu0 %v4137_v19 }
 0x338   : > { %v1175_v57 = vpop.xlane.xlu1 %1174 }
 0x339   : > { %v1177_v11 = vmul.f32 0.001953125, %v1175_v57  ;;  %v4138_v57 = vld [vmem:[%s5367_s26 + $0x760] ss:$16 sps:$4 sm:$0xff]  }
 0x33a   : > { %2235 = vmatpush1.bf16.msra.mxu1 %v4138_v57 }
 0x33b   : > { %v5396_v12 = vsub.f32 %v5298_v30, %v1177_v11  ;;  %v5399_v14 = vsub.f32 %v5300_v31, %v1177_v11  ;;  %v5406_v23 = vsub.f32 %v5302_v32, %v1177_v11 }
 0x33d   : > { %v1190_v21 = vmul.f32 %v5396_v12, %v5396_v12  ;;  %v1191_v27 = vmul.f32 %v5399_v14, %v5399_v14  ;;  %v1192_v36 = vmul.f32 %v5406_v23, %v5406_v23 }
 0x33f   : > { %v1203_v26 = vsel %vm1157_vm2, %v1190_v21, 0.0  ;;  %v1206_v46 = vsel %vm1157_vm2, %v1192_v36, 0.0  ;;  %v4143_v21 = vld [vmem:[%s5367_s26 + $0x580] ss:$16 sps:$4 sm:$0xff]   ;;  %v4159_v36 = vld [vmem:[%s5367_s26 + $0x7e4] ss:$16 sps:$4 sm:$0xff]  }
 0x345   : > { %v1166_v20 = vpop.xlane.xlu0 %1165 }
 0x346   : > { %v1176_v22 = vmul.f32 0.001953125, %v1166_v20  ;;  %v4141_v20 = vld [vmem:[%s5367_s26 + $0x784] ss:$16 sps:$4 sm:$0xff]  }
 0x347   : > { %2236 = vmatprep.subr.bf16.mxu1 %v4141_v20 }
 0x348   : > { %v5409_v24 = vsub.f32 %v5350_v44, %v1176_v22  ;;  %v5412_v30 = vsub.f32 %v5352_v63, %v1176_v22  ;;  %v5415_v31 = vsub.f32 %v5354_v29, %v1176_v22  ;;  %v5418_v25 = vsub.f32 %v5356_v34, %v1176_v22  ;;  %v4144_v22 = vld [vmem:[%s5367_s26 + $0x780] ss:$16 sps:$4 sm:$0xff]  }
 0x349   : > { %v1204_v44 = vsel %vm1157_vm2, %v1191_v27, 0.0  ;;  %v5429_v63 = vsub.f32 %v5304_v33, %v1177_v11  ;;  %v4139_v11 = vld [vmem:[%s5367_s26 + $0x584] ss:$16 sps:$4 sm:$0xff]   ;;  %2237 = vmatpush1.bf16.msra.mxu1 %v4144_v22 }
 0x34a   : > { %v1186_v62 = vmul.f32 %v5409_v24, %v5409_v24  ;;  %v1187_v32 = vmul.f32 %v5412_v30, %v5412_v30  ;;  %v1188_v28 = vmul.f32 %v5415_v31, %v5415_v31  ;;  %v1189_v29 = vmul.f32 %v5418_v25, %v5418_v25  ;;  %2195 = vmatprep.subr.bf16.mxu0 %v4139_v11  ;;  %v4145_v27 = vld [vmem:[%s5367_s26 + $0x5a4] ss:$16 sps:$4 sm:$0xff]  }
 0x34b   : > { %v1205_v41 = vadd.f32 %v1204_v44, %v1203_v26  ;;  %v1193_v43 = vmul.f32 %v5429_v63, %v5429_v63  ;;  %v4147_v26 = vld [vmem:[%s5367_s26 + $0x7a4] ss:$16 sps:$4 sm:$0xff]   ;;  %2196 = vmatpush1.bf16.msra.mxu0 %v4143_v21 }
 0x34c   : > { %v1194_v34 = vsel %vm1157_vm2, %v1186_v62, 0.0  ;;  %v1195_v35 = vsel %vm1157_vm2, %v1187_v32, 0.0  ;;  %v1197_v50 = vsel %vm1157_vm2, %v1188_v28, 0.0  ;;  %v1199_v13 = vsel %vm1157_vm2, %v1189_v29, 0.0  ;;  %v4149_v62 = vld [vmem:[%s5367_s26 + $0x5a0] ss:$16 sps:$4 sm:$0xff]   ;;  %2197 = vmatprep.subr.bf16.mxu0 %v4145_v27  ;;  %2238 = vmatprep.subr.bf16.mxu1 %v4147_v26 }
 0x34d   : > { %v1196_v39 = vadd.f32 %v1195_v35, %v1194_v34  ;;  %v1207_v49 = vadd.f32 %v1206_v46, %v1205_v41  ;;  %v1208_v51 = vsel %vm1157_vm2, %v1193_v43, 0.0  ;;  %v4150_v32 = vld [vmem:[%s5367_s26 + $0x7a0] ss:$16 sps:$4 sm:$0xff]   ;;  %v4151_v28 = vld [vmem:[%s5367_s26 + $0x5c4] ss:$16 sps:$4 sm:$0xff]  }
 0x34e   : > { %v4153_v44 = vld [vmem:[%s5367_s26 + $0x7c4] ss:$16 sps:$4 sm:$0xff]   ;;  %2239 = vmatpush1.bf16.msra.mxu1 %v4150_v32  ;;  %v4155_v29 = vld [vmem:[%s5367_s26 + $0x5c0] ss:$16 sps:$4 sm:$0xff]  }
 0x34f   : > { %v1198_v33 = vadd.f32 %v1197_v50, %v1196_v39  ;;  %v1209_v52 = vadd.f32 %v1208_v51, %v1207_v49  ;;  %2198 = vmatpush1.bf16.msra.mxu0 %v4149_v62  ;;  %v4156_v34 = vld [vmem:[%s5367_s26 + $0x7c0] ss:$16 sps:$4 sm:$0xff]   ;;  %2240 = vmatprep.subr.bf16.mxu1 %v4153_v44  ;;  %v4157_v35 = vld [vmem:[%s5367_s26 + $0x5e4] ss:$16 sps:$4 sm:$0xff]   ;;  %v4165_v50 = vld [vmem:[%s5367_s26 + $0x40c] ss:$16 sps:$4 sm:$0xff]  }
 0x350   : > { %2199 = vmatprep.subr.bf16.mxu0 %v4151_v28  ;;  %v4161_v39 = vld [vmem:[%s5367_s26 + $0x5e0] ss:$16 sps:$4 sm:$0xff]  }
 0x351   : > { %v1200_v48 = vadd.f32 %v1199_v13, %v1198_v33  ;;  %v4162_v41 = vld [vmem:[%s5367_s26 + $0x7e0] ss:$16 sps:$4 sm:$0xff]   ;;  %v4168_v33 = vld [vmem:[%s5367_s26 + $0x60c] ss:$16 sps:$4 sm:$0xff]  }
 0x352   : > { %2241 = vmatpush1.bf16.msra.mxu1 %v4156_v34 }
 0x353   : > { %1201 = vadd.xlane.f32.xlu0 %v1200_v48  ;;  %2200 = vmatpush1.bf16.msra.mxu0 %v4155_v29 }
 0x354   : > { %2201 = vmatprep.subr.bf16.mxu0 %v4157_v35  ;;  %2242 = vmatprep.subr.bf16.mxu1 %v4159_v36  ;;  %v4163_v36 = vld [vmem:[%s5367_s26 + $0x408] ss:$16 sps:$4 sm:$0xff]  }
 0x356   : > { %2243 = vmatpush1.bf16.msra.mxu1 %v4162_v41 }
 0x357   : > { %1210 = vadd.xlane.f32.xlu0 %v1209_v52  ;;  %2202 = vmatpush1.bf16.msra.mxu0 %v4161_v39 }
 0x358   : > { %2253 = vmatprep.subr.bf16.mxu0 %v4165_v50  ;;  %2294 = vmatprep.subr.bf16.mxu1 %v4168_v33  ;;  %v4166_v33 = vld [vmem:[%s5367_s26 + $0x608] ss:$16 sps:$4 sm:$0xff]  }
 0x3e0   : > { %v1202_v13 = vpop.xlane.xlu0 %1201 }
 0x3e1   : > { %v1212_v43 = vmul.f32 0.001953125, %v1202_v13 }
 0x3e3   : > { %v1214_v46 = vadd.f32 1e-05, %v1212_v43 }
 0x3e4   : > { %v1211_v48 = vpop.xlane.xlu0 %1210 }
 0x3e5   : > { %4457 = vrsqrt.f32 %v1214_v46  ;;  %v1213_v49 = vmul.f32 0.001953125, %v1211_v48 }
 0x3e7   : > { %v1215_v51 = vadd.f32 1e-05, %v1213_v49  ;;  %v4171_v49 = vld [vmem:[%s5367_s26 + $0x42c] ss:$16 sps:$4 sm:$0xff]  }
 0x3e9   : > { %4459 = vrsqrt.f32 %v1215_v51 }
 0x3ef   : > { %v4458_v52 = vpop.eup %4457 }
 0x3f0   : > { %v1219_v53 = vmul.f32 %v4458_v52, %v5412_v30  ;;  %v1221_v54 = vmul.f32 %v4458_v52, %v5418_v25  ;;  %v1218_v56 = vmul.f32 %v4458_v52, %v5409_v24  ;;  %v1220_v0 = vmul.f32 %v4458_v52, %v5415_v31 }
 0x3f2   : > { %4461 = vtanh.f32 %v1219_v53  ;;  %v4174_v53 = vld [vmem:[%s5367_s26 + $0x62c] ss:$16 sps:$4 sm:$0xff]  }
 0x3f3   : > { %v4460_v1 = vpop.eup %4459  ;;  %4463 = vtanh.f32 %v1221_v54 }
 0x3f4   : > { %v1223_v2 = vmul.f32 %v4460_v1, %v5399_v14  ;;  %v1225_v7 = vmul.f32 %v4460_v1, %v5429_v63  ;;  %v1222_v3 = vmul.f32 %v4460_v1, %v5396_v12  ;;  %4465 = vtanh.f32 %v1218_v56  ;;  %v4169_v56 = vld [vmem:[%s5367_s26 + $0x428] ss:$16 sps:$4 sm:$0xff]  }
 0x3f5   : > { %v1224_v4 = vmul.f32 %v4460_v1, %v5406_v23  ;;  %4467 = vtanh.f32 %v1220_v0  ;;  %v4172_v0 = vld [vmem:[%s5367_s26 + $0x628] ss:$16 sps:$4 sm:$0xff]   ;;  %v4177_v1 = vld [vmem:[%s5367_s26 + $0x44c] ss:$16 sps:$4 sm:$0xff]  }
 0x3f6   : > { %4469 = vtanh.f32 %v1223_v2  ;;  %v4180_v2 = vld [vmem:[%s5367_s26 + $0x64c] ss:$16 sps:$4 sm:$0xff]  }
 0x3f7   : > { %4471 = vtanh.f32 %v1225_v7  ;;  %v4175_v7 = vld [vmem:[%s5367_s26 + $0x448] ss:$16 sps:$4 sm:$0xff]  }
 0x3f8   : > { %4473 = vtanh.f32 %v1222_v3  ;;  %v4178_v3 = vld [vmem:[%s5367_s26 + $0x648] ss:$16 sps:$4 sm:$0xff]  }
 0x3f9   : > { %4475 = vtanh.f32 %v1224_v4  ;;  %v4183_v4 = vld [vmem:[%s5367_s26 + $0x46c] ss:$16 sps:$4 sm:$0xff]  }
 0x3fc   : > { %v4462_v24 = vpop.eup %4461 }
 0x3fd   : > { %v4464_v30 = vpop.eup %4463  ;;  %v1235_v31 = vpack.c.bf16 %v4462_v24, %v4462_v24  ;;  %v4186_v24 = vld [vmem:[%s5367_s26 + $0x66c] ss:$16 sps:$4 sm:$0xff]  }
 0x3fe   : > { %v4466_v25 = vpop.eup %4465  ;;  %v1237_v5 = vpack.c.bf16 %v4464_v30, %v4464_v30  ;;  %v4181_v30 = vld [vmem:[%s5367_s26 + $0x468] ss:$16 sps:$4 sm:$0xff]  }
 0x3ff   : > { %v4468_v6 = vpop.eup %4467  ;;  %v1508_v55 = vunpack.c.l.b16 %v1235_v31  ;;  %v1234_v14 = vpack.c.bf16 %v4466_v25, %v4466_v25  ;;  %v4184_v31 = vld [vmem:[%s5367_s26 + $0x668] ss:$16 sps:$4 sm:$0xff]   ;;  %v4189_v25 = vld [vmem:[%s5367_s26 + $0x48c] ss:$16 sps:$4 sm:$0xff]  }
 0x400   : > { %v4470_v8 = vpop.eup %4469  ;;  %v1510_v63 = vunpack.c.l.b16 %v1237_v5  ;;  %v1236_v9 = vpack.c.bf16 %v4468_v6, %v4468_v6  ;;  %v4192_v5 = vld [vmem:[%s5367_s26 + $0x68c] ss:$16 sps:$4 sm:$0xff]   ;;  %v4187_v6 = vld [vmem:[%s5367_s26 + $0x488] ss:$16 sps:$4 sm:$0xff]  }
 0x401   : > { %v4472_v12 = vpop.eup %4471  ;;  %v1239_v10 = vpack.c.bf16 %v4470_v8, %v4470_v8  ;;  %v1507_v15 = vunpack.c.l.b16 %v1234_v14  ;;  %v1517_v19 = vrot.slane %v1508_v55, 1  ;;  %v4195_v14 = vld [vmem:[%s5367_s26 + $0x4ac] ss:$16 sps:$4 sm:$0xff]  }
 0x402   : > { %v4474_v23 = vpop.eup %4473  ;;  %v1241_v16 = vpack.c.bf16 %v4472_v12, %v4472_v12  ;;  %v1509_v17 = vunpack.c.l.b16 %v1236_v9  ;;  %v1521_v20 = vrot.slane %v1510_v63, 1  ;;  %v4198_v8 = vld [vmem:[%s5367_s26 + $0x6ac] ss:$16 sps:$4 sm:$0xff]   ;;  %v4196_v9 = vld [vmem:[%s5367_s26 + $0x6a8] ss:$16 sps:$4 sm:$0xff]  }
 0x403   : > { %v4476_v18 = vpop.eup %4475  ;;  %v1512_v61 = vunpack.c.l.b16 %v1239_v10  ;;  %v1238_v57 = vpack.c.bf16 %v4474_v23, %v4474_v23  ;;  %v1515_v21 = vrot.slane %v1507_v15, 1  ;;  %v4201_v12 = vld [vmem:[%s5367_s26 + $0x4cc] ss:$16 sps:$4 sm:$0xff]   ;;  %v4202_v23 = vld [vmem:[%s5367_s26 + $0x6c8] ss:$16 sps:$4 sm:$0xff]  }
 0x404   : > { %v1514_v11 = vunpack.c.l.b16 %v1241_v16  ;;  %v1240_v22 = vpack.c.bf16 %v4476_v18, %v4476_v18  ;;  %v1519_v32 = vrot.slane %v1509_v17, 1  ;;  %v4204_v10 = vld [vmem:[%s5367_s26 + $0x6cc] ss:$16 sps:$4 sm:$0xff]   ;;  %v4205_v18 = vld [vmem:[%s5367_s26 + $0x4e8] ss:$16 sps:$4 sm:$0xff]  }
 0x405   : > { %v1518_v27 = vsel %vm653_vm1, %v1512_v61, %v1517_v19  ;;  %v2337_v26 = vrot.slane %v1512_v61, 7  ;;  %v1511_v62 = vunpack.c.l.b16 %v1238_v57  ;;  %v4207_v16 = vld [vmem:[%s5367_s26 + $0x4ec] ss:$16 sps:$4 sm:$0xff]   ;;  %v4208_v61 = vld [vmem:[%s5367_s26 + $0x6e8] ss:$16 sps:$4 sm:$0xff]  }
 0x406   : > { %v1524_v28 = vpack.c.b16 %v1518_v27, %v1518_v27  ;;  %v1522_v44 = vsel %vm653_vm1, %v1514_v11, %v1521_v20  ;;  %v2341_v29 = vrot.slane %v1514_v11, 7  ;;  %v1513_v34 = vunpack.c.l.b16 %v1240_v22  ;;  %v4213_v19 = vld [vmem:[%s5367_s26 + $0x50c] ss:$16 sps:$4 sm:$0xff]   ;;  %v4211_v11 = vld [vmem:[%s5367_s26 + $0x508] ss:$16 sps:$4 sm:$0xff]  }
 0x407   : > { %v1526_v35 = vpack.c.b16 %v1522_v44, %v1522_v44  ;;  %v1516_v39 = vsel %vm653_vm1, %v1511_v62, %v1515_v21  ;;  %v2335_v41 = vrot.slane %v1511_v62, 7  ;;  %v5496_v50 = vsel %vm653_vm1, %v2337_v26, %v1508_v55  ;;  %v4190_v55 = vld [vmem:[%s5367_s26 + $0x688] ss:$16 sps:$4 sm:$0xff]   ;;  %v4216_v57 = vld [vmem:[%s5367_s26 + $0x70c] ss:$16 sps:$4 sm:$0xff]  }
 0x408   : > { %2203 = vmatprep.mubr.bf16.mxu0 %v1524_v28  ;;  %v5499_v13 = vpack.c.b16 %v1516_v39, %v1516_v39  ;;  %v1520_v43 = vsel %vm653_vm1, %v1513_v34, %v1519_v32  ;;  %v2339_v46 = vrot.slane %v1513_v34, 7  ;;  %v5506_v51 = vsel %vm653_vm1, %v2341_v29, %v1510_v63  ;;  %v4193_v63 = vld [vmem:[%s5367_s26 + $0x4a8] ss:$16 sps:$4 sm:$0xff]   ;;  %v4219_v21 = vld [vmem:[%s5367_s26 + $0x52c] ss:$16 sps:$4 sm:$0xff]  }
 0x409   : > { %2244 = vmatprep.mubr.bf16.mxu1 %v1526_v35  ;;  %v5502_v48 = vpack.c.b16 %v1520_v43, %v1520_v43  ;;  %v5509_v52 = vsel %vm653_vm1, %v2335_v41, %v1507_v15  ;;  %v4199_v15 = vld [vmem:[%s5367_s26 + $0x4c8] ss:$16 sps:$4 sm:$0xff]   ;;  %v4222_v22 = vld [vmem:[%s5367_s26 + $0x72c] ss:$16 sps:$4 sm:$0xff]  }
 0x40a   : > { %2204 = vmatmul.mubr.bf16.vlgmr.msra.gmra.mrb[0].mxu0 %v5499_v13  ;;  %v5514_v54 = vsel %vm653_vm1, %v2339_v46, %v1509_v17  ;;  %v4210_v17 = vld [vmem:[%s5367_s26 + $0x6ec] ss:$16 sps:$4 sm:$0xff]   ;;  %v4214_v20 = vld [vmem:[%s5367_s26 + $0x708] ss:$16 sps:$4 sm:$0xff]  }
 0x40b   : > { %2245 = vmatmul.mubr.bf16.vlgmr.msra.gmra.mrb[0].mxu1 %v5502_v48  ;;  %2254 = vmatpush1.bf16.msra.mxu0 %v4163_v36  ;;  %v4217_v27 = vld [vmem:[%s5367_s26 + $0x528] ss:$16 sps:$4 sm:$0xff]   ;;  %v4225_v62 = vld [vmem:[%s5367_s26 + $0x54c] ss:$16 sps:$4 sm:$0xff]  }
 0x40c   : > { %2295 = vmatpush1.bf16.msra.mxu1 %v4166_v33  ;;  %2285 = vmatprep.mubr.bf16.mxu0 %v1524_v28  ;;  %v4220_v26 = vld [vmem:[%s5367_s26 + $0x728] ss:$16 sps:$4 sm:$0xff]   ;;  %v4228_v32 = vld [vmem:[%s5367_s26 + $0x74c] ss:$16 sps:$4 sm:$0xff]  }
 0x40d   : > { %2326 = vmatprep.mubr.bf16.mxu1 %v1526_v35  ;;  %2255 = vmatprep.subr.bf16.mxu0 %v4171_v49  ;;  %v4223_v28 = vld [vmem:[%s5367_s26 + $0x548] ss:$16 sps:$4 sm:$0xff]   ;;  %v4231_v29 = vld [vmem:[%s5367_s26 + $0x56c] ss:$16 sps:$4 sm:$0xff]  }
 0x40e   : > { %2296 = vmatprep.subr.bf16.mxu1 %v4174_v53  ;;  %v4226_v44 = vld [vmem:[%s5367_s26 + $0x748] ss:$16 sps:$4 sm:$0xff]   ;;  %v4234_v34 = vld [vmem:[%s5367_s26 + $0x76c] ss:$16 sps:$4 sm:$0xff]  }
 0x40f   : > { %2256 = vmatpush1.bf16.msra.mxu0 %v4169_v56  ;;  %v4229_v35 = vld [vmem:[%s5367_s26 + $0x568] ss:$16 sps:$4 sm:$0xff]   ;;  %v4237_v39 = vld [vmem:[%s5367_s26 + $0x58c] ss:$16 sps:$4 sm:$0xff]  }
 0x410   : > { %2297 = vmatpush1.bf16.msra.mxu1 %v4172_v0  ;;  %2257 = vmatprep.subr.bf16.mxu0 %v4177_v1  ;;  %v4232_v36 = vld [vmem:[%s5367_s26 + $0x768] ss:$16 sps:$4 sm:$0xff]   ;;  %v4240_v41 = vld [vmem:[%s5367_s26 + $0x78c] ss:$16 sps:$4 sm:$0xff]  }
 0x411   : > { %2298 = vmatprep.subr.bf16.mxu1 %v4180_v2  ;;  %v4235_v33 = vld [vmem:[%s5367_s26 + $0x588] ss:$16 sps:$4 sm:$0xff]   ;;  %v4243_v46 = vld [vmem:[%s5367_s26 + $0x5ac] ss:$16 sps:$4 sm:$0xff]  }
 0x412   : > { %v4238_v43 = vld [vmem:[%s5367_s26 + $0x788] ss:$16 sps:$4 sm:$0xff]   ;;  %v4246_v49 = vld [vmem:[%s5367_s26 + $0x7ac] ss:$16 sps:$4 sm:$0xff]  }
 0x413   : > { %2258 = vmatpush1.bf16.msra.mxu0 %v4175_v7  ;;  %v4241_v53 = vld [vmem:[%s5367_s26 + $0x5a8] ss:$16 sps:$4 sm:$0xff]   ;;  %v4249_v0 = vld [vmem:[%s5367_s26 + $0x5cc] ss:$16 sps:$4 sm:$0xff]  }
 0x414   : > { %2299 = vmatpush1.bf16.msra.mxu1 %v4178_v3  ;;  %2259 = vmatprep.subr.bf16.mxu0 %v4183_v4  ;;  %v4244_v56 = vld [vmem:[%s5367_s26 + $0x7a8] ss:$16 sps:$4 sm:$0xff]   ;;  %v4252_v1 = vld [vmem:[%s5367_s26 + $0x7cc] ss:$16 sps:$4 sm:$0xff]  }
 0x415   : > { %2300 = vmatprep.subr.bf16.mxu1 %v4186_v24  ;;  %v4247_v2 = vld [vmem:[%s5367_s26 + $0x5c8] ss:$16 sps:$4 sm:$0xff]   ;;  %v4255_v3 = vld [vmem:[%s5367_s26 + $0x5ec] ss:$16 sps:$4 sm:$0xff]  }
 0x416   : > { %v4250_v7 = vld [vmem:[%s5367_s26 + $0x7c8] ss:$16 sps:$4 sm:$0xff]   ;;  %v4258_v4 = vld [vmem:[%s5367_s26 + $0x7ec] ss:$16 sps:$4 sm:$0xff]  }
 0x417   : > { %2260 = vmatpush1.bf16.msra.mxu0 %v4181_v30  ;;  %v4253_v24 = vld [vmem:[%s5367_s26 + $0x5e8] ss:$16 sps:$4 sm:$0xff]  }
 0x418   : > { %2301 = vmatpush1.bf16.msra.mxu1 %v4184_v31  ;;  %2261 = vmatprep.subr.bf16.mxu0 %v4189_v25  ;;  %v4256_v30 = vld [vmem:[%s5367_s26 + $0x7e8] ss:$16 sps:$4 sm:$0xff]   ;;  %v4261_v31 = vld [vmem:[%s5367_s26 + $0x4] ss:$16 sps:$4 sm:$0xff]  }
 0x419   : > { %2302 = vmatprep.subr.bf16.mxu1 %v4192_v5  ;;  %v4264_v25 = vld [vmem:[%s5367_s26 + $0x204] ss:$16 sps:$4 sm:$0xff]   ;;  %v4259_v5 = vld [vmem:[%s5367_s26] ss:$16 sps:$4 sm:$0xff]  }
 0x41b   : > { %2262 = vmatpush1.bf16.msra.mxu0 %v4187_v6  ;;  %v4262_v6 = vld [vmem:[%s5367_s26 + $0x200] ss:$16 sps:$4 sm:$0xff]  }
 0x41c   : > { %2303 = vmatpush1.bf16.msra.mxu1 %v4190_v55  ;;  %2263 = vmatprep.subr.bf16.mxu0 %v4195_v14  ;;  %v4267_v55 = vld [vmem:[%s5367_s26 + $0x24] ss:$16 sps:$4 sm:$0xff]   ;;  %v5583_v14 = vpack.c.b16 %v5496_v50, %v5496_v50 }
 0x41d   : > { %2304 = vmatprep.subr.bf16.mxu1 %v4198_v8  ;;  %v4270_v8 = vld [vmem:[%s5367_s26 + $0x224] ss:$16 sps:$4 sm:$0xff]  }
 0x41e   : > { %v4276_v50 = vld [vmem:[%s5367_s26 + $0x244] ss:$16 sps:$4 sm:$0xff]  }
 0x41f   : > { %2264 = vmatpush1.bf16.msra.mxu0 %v4193_v63  ;;  %v5589_v63 = vpack.c.b16 %v5506_v51, %v5506_v51  ;;  %v4274_v51 = vld [vmem:[%s5367_s26 + $0x240] ss:$16 sps:$4 sm:$0xff]  }
 0x420   : > { %2305 = vmatpush1.bf16.msra.mxu1 %v4196_v9  ;;  %2265 = vmatprep.subr.bf16.mxu0 %v4201_v12  ;;  %v4265_v9 = vld [vmem:[%s5367_s26 + $0x20] ss:$16 sps:$4 sm:$0xff]   ;;  %v4273_v12 = vld [vmem:[%s5367_s26 + $0x44] ss:$16 sps:$4 sm:$0xff]  }
 0x421   : > { %2306 = vmatprep.subr.bf16.mxu1 %v4204_v10  ;;  %v4279_v10 = vld [vmem:[%s5367_s26 + $0x64] ss:$16 sps:$4 sm:$0xff]  }
 0x423   : > { %2266 = vmatpush1.bf16.msra.mxu0 %v4199_v15  ;;  %v4282_v15 = vld [vmem:[%s5367_s26 + $0x264] ss:$16 sps:$4 sm:$0xff]  }
 0x424   : > { %2307 = vmatpush1.bf16.msra.mxu1 %v4202_v23  ;;  %2267 = vmatprep.subr.bf16.mxu0 %v4207_v16  ;;  %v4277_v23 = vld [vmem:[%s5367_s26 + $0x60] ss:$16 sps:$4 sm:$0xff]  }
 0x425   : > { %2308 = vmatprep.subr.bf16.mxu1 %v4210_v17  ;;  %v4280_v16 = vld [vmem:[%s5367_s26 + $0x260] ss:$16 sps:$4 sm:$0xff]   ;;  %v4285_v17 = vld [vmem:[%s5367_s26 + $0x84] ss:$16 sps:$4 sm:$0xff]  }
 0x427   : > { %2268 = vmatpush1.bf16.msra.mxu0 %v4205_v18  ;;  %v4288_v18 = vld [vmem:[%s5367_s26 + $0x284] ss:$16 sps:$4 sm:$0xff]  }
 0x428   : > { %2309 = vmatpush1.bf16.msra.mxu1 %v4208_v61  ;;  %2269 = vmatprep.subr.bf16.mxu0 %v4213_v19  ;;  %v4283_v61 = vld [vmem:[%s5367_s26 + $0x80] ss:$16 sps:$4 sm:$0xff]  }
 0x429   : > { %2310 = vmatprep.subr.bf16.mxu1 %v4216_v57  ;;  %v4286_v19 = vld [vmem:[%s5367_s26 + $0x280] ss:$16 sps:$4 sm:$0xff]   ;;  %v4291_v57 = vld [vmem:[%s5367_s26 + $0xa4] ss:$16 sps:$4 sm:$0xff]  }
 0x42b   : > { %2270 = vmatpush1.bf16.msra.mxu0 %v4211_v11  ;;  %v4294_v11 = vld [vmem:[%s5367_s26 + $0x2a4] ss:$16 sps:$4 sm:$0xff]  }
 0x42c   : > { %2311 = vmatpush1.bf16.msra.mxu1 %v4214_v20  ;;  %2271 = vmatprep.subr.bf16.mxu0 %v4219_v21  ;;  %v4289_v20 = vld [vmem:[%s5367_s26 + $0xa0] ss:$16 sps:$4 sm:$0xff]  }
 0x42d   : > { %2312 = vmatprep.subr.bf16.mxu1 %v4222_v22  ;;  %v4292_v21 = vld [vmem:[%s5367_s26 + $0x2a0] ss:$16 sps:$4 sm:$0xff]   ;;  %v4297_v22 = vld [vmem:[%s5367_s26 + $0xc4] ss:$16 sps:$4 sm:$0xff]  }
 0x42f   : > { %2272 = vmatpush1.bf16.msra.mxu0 %v4217_v27  ;;  %v4300_v27 = vld [vmem:[%s5367_s26 + $0x2c4] ss:$16 sps:$4 sm:$0xff]  }
 0x430   : > { %2313 = vmatpush1.bf16.msra.mxu1 %v4220_v26  ;;  %2273 = vmatprep.subr.bf16.mxu0 %v4225_v62  ;;  %v4295_v26 = vld [vmem:[%s5367_s26 + $0xc0] ss:$16 sps:$4 sm:$0xff]  }
 0x431   : > { %2314 = vmatprep.subr.bf16.mxu1 %v4228_v32  ;;  %v4298_v62 = vld [vmem:[%s5367_s26 + $0x2c0] ss:$16 sps:$4 sm:$0xff]   ;;  %v4303_v32 = vld [vmem:[%s5367_s26 + $0xe4] ss:$16 sps:$4 sm:$0xff]  }
 0x433   : > { %2274 = vmatpush1.bf16.msra.mxu0 %v4223_v28  ;;  %v4306_v28 = vld [vmem:[%s5367_s26 + $0x2e4] ss:$16 sps:$4 sm:$0xff]  }
 0x434   : > { %2315 = vmatpush1.bf16.msra.mxu1 %v4226_v44  ;;  %2275 = vmatprep.subr.bf16.mxu0 %v4231_v29  ;;  %v3950_v44 = vld [vmem:[%s571_s2] ss:$0 sm:$0xff]  ;;  %v4301_v29 = vld [vmem:[%s5367_s26 + $0xe0] ss:$16 sps:$4 sm:$0xff]  }
 0x435   : > { %2316 = vmatprep.subr.bf16.mxu1 %v4234_v34  ;;  %3162 = vperm.xlu0 %4062, %v3950_v44   ;;  %v4304_v34 = vld [vmem:[%s5367_s26 + $0x2e0] ss:$16 sps:$4 sm:$0xff]   ;;  %v4379_v44 = vld [vmem:[%s5367_s26 + $0x88] ss:$16 sps:$4 sm:$0xff]  }
 0x437   : > { %2276 = vmatpush1.bf16.msra.mxu0 %v4229_v35  ;;  %v4309_v35 = vld [vmem:[%s5367_s26 + $0x104] ss:$16 sps:$4 sm:$0xff]  }
 0x438   : > { %2317 = vmatpush1.bf16.msra.mxu1 %v4232_v36  ;;  %2277 = vmatprep.subr.bf16.mxu0 %v4237_v39  ;;  %v4312_v36 = vld [vmem:[%s5367_s26 + $0x304] ss:$16 sps:$4 sm:$0xff]   ;;  %v4307_v39 = vld [vmem:[%s5367_s26 + $0x100] ss:$16 sps:$4 sm:$0xff]  }
 0x439   : > { %2318 = vmatprep.subr.bf16.mxu1 %v4240_v41  ;;  %v4310_v41 = vld [vmem:[%s5367_s26 + $0x300] ss:$16 sps:$4 sm:$0xff]  }
 0x43b   : > { %2278 = vmatpush1.bf16.msra.mxu0 %v4235_v33  ;;  %v4315_v33 = vld [vmem:[%s5367_s26 + $0x124] ss:$16 sps:$4 sm:$0xff]  }
 0x43c   : > { %2319 = vmatpush1.bf16.msra.mxu1 %v4238_v43  ;;  %2279 = vmatprep.subr.bf16.mxu0 %v4243_v46  ;;  %v4318_v43 = vld [vmem:[%s5367_s26 + $0x324] ss:$16 sps:$4 sm:$0xff]   ;;  %v4313_v46 = vld [vmem:[%s5367_s26 + $0x120] ss:$16 sps:$4 sm:$0xff]  }
 0x43d   : > { %2320 = vmatprep.subr.bf16.mxu1 %v4246_v49  ;;  %v4316_v49 = vld [vmem:[%s5367_s26 + $0x320] ss:$16 sps:$4 sm:$0xff]  }
 0x43f   : > { %2280 = vmatpush1.bf16.msra.mxu0 %v4241_v53  ;;  %v4321_v53 = vld [vmem:[%s5367_s26 + $0x144] ss:$16 sps:$4 sm:$0xff]  }
 0x440   : > { %2321 = vmatpush1.bf16.msra.mxu1 %v4244_v56  ;;  %2281 = vmatprep.subr.bf16.mxu0 %v4249_v0  ;;  %v4324_v56 = vld [vmem:[%s5367_s26 + $0x344] ss:$16 sps:$4 sm:$0xff]   ;;  %v4319_v0 = vld [vmem:[%s5367_s26 + $0x140] ss:$16 sps:$4 sm:$0xff]  }
 0x441   : > { %2322 = vmatprep.subr.bf16.mxu1 %v4252_v1  ;;  %v4322_v1 = vld [vmem:[%s5367_s26 + $0x340] ss:$16 sps:$4 sm:$0xff]  }
 0x443   : > { %2282 = vmatpush1.bf16.msra.mxu0 %v4247_v2  ;;  %v4327_v2 = vld [vmem:[%s5367_s26 + $0x164] ss:$16 sps:$4 sm:$0xff]  }
 0x444   : > { %2323 = vmatpush1.bf16.msra.mxu1 %v4250_v7  ;;  %2283 = vmatprep.subr.bf16.mxu0 %v4255_v3  ;;  %v4330_v7 = vld [vmem:[%s5367_s26 + $0x364] ss:$16 sps:$4 sm:$0xff]   ;;  %v4325_v3 = vld [vmem:[%s5367_s26 + $0x160] ss:$16 sps:$4 sm:$0xff]  }
 0x445   : > { %2324 = vmatprep.subr.bf16.mxu1 %v4258_v4  ;;  %v4328_v4 = vld [vmem:[%s5367_s26 + $0x360] ss:$16 sps:$4 sm:$0xff]  }
 0x447   : > { %2284 = vmatpush1.bf16.msra.mxu0 %v4253_v24  ;;  %v4333_v24 = vld [vmem:[%s5367_s26 + $0x184] ss:$16 sps:$4 sm:$0xff]  }
 0x448   : > { %2325 = vmatpush1.bf16.msra.mxu1 %v4256_v30  ;;  %2991 = vmatprep.subr.bf16.mxu0 %v4261_v31  ;;  %v4336_v30 = vld [vmem:[%s5367_s26 + $0x384] ss:$16 sps:$4 sm:$0xff]   ;;  %v4331_v31 = vld [vmem:[%s5367_s26 + $0x180] ss:$16 sps:$4 sm:$0xff]  }
 0x449   : > { %3032 = vmatprep.subr.bf16.mxu1 %v4264_v25  ;;  %v4334_v25 = vld [vmem:[%s5367_s26 + $0x380] ss:$16 sps:$4 sm:$0xff]  }
 0x44a   : > { %2286 = vmatmul.mubr.bf16.vlgmr.msra.gmra.mrb[4].mxu0 %v5499_v13  ;;  %v4268_v13 = vld [vmem:[%s5367_s26 + $0x220] ss:$16 sps:$4 sm:$0xff]  }
 0x44b   : > { %2327 = vmatmul.mubr.bf16.vlgmr.msra.gmra.mrb[4].mxu1 %v5502_v48  ;;  %2992 = vmatpush1.bf16.msra.mxu0 %v4259_v5  ;;  %v4271_v48 = vld [vmem:[%s5367_s26 + $0x40] ss:$16 sps:$4 sm:$0xff]   ;;  %v4339_v5 = vld [vmem:[%s5367_s26 + $0x1a4] ss:$16 sps:$4 sm:$0xff]  }
 0x44c   : > { %3023 = vmatprep.mubr.bf16.mxu0 %v5583_v14  ;;  %3033 = vmatpush1.bf16.msra.mxu1 %v4262_v6  ;;  %v4342_v6 = vld [vmem:[%s5367_s26 + $0x3a4] ss:$16 sps:$4 sm:$0xff]  }
 0x44d   : > { %3064 = vmatprep.mubr.bf16.mxu1 %v5589_v63  ;;  %2993 = vmatprep.subr.bf16.mxu0 %v4267_v55  ;;  %v4337_v55 = vld [vmem:[%s5367_s26 + $0x1a0] ss:$16 sps:$4 sm:$0xff]  }
 0x44e   : > { %3034 = vmatprep.subr.bf16.mxu1 %v4270_v8  ;;  %v4340_v8 = vld [vmem:[%s5367_s26 + $0x3a0] ss:$16 sps:$4 sm:$0xff]  }
 0x44f   : > { %2994 = vmatpush1.bf16.msra.mxu0 %v4265_v9  ;;  %v4345_v9 = vld [vmem:[%s5367_s26 + $0x1c4] ss:$16 sps:$4 sm:$0xff]  }
 0x450   : > { %3035 = vmatpush1.bf16.msra.mxu1 %v4268_v13  ;;  %2995 = vmatprep.subr.bf16.mxu0 %v4273_v12  ;;  %v4348_v13 = vld [vmem:[%s5367_s26 + $0x3c4] ss:$16 sps:$4 sm:$0xff]   ;;  %v4343_v12 = vld [vmem:[%s5367_s26 + $0x1c0] ss:$16 sps:$4 sm:$0xff]  }
 0x451   : > { %3036 = vmatprep.subr.bf16.mxu1 %v4276_v50  ;;  %v4346_v50 = vld [vmem:[%s5367_s26 + $0x3c0] ss:$16 sps:$4 sm:$0xff]  }
 0x453   : > { %2996 = vmatpush1.bf16.msra.mxu0 %v4271_v48  ;;  %v4351_v48 = vld [vmem:[%s5367_s26 + $0x1e4] ss:$16 sps:$4 sm:$0xff]  }
 0x454   : > { %3037 = vmatpush1.bf16.msra.mxu1 %v4274_v51  ;;  %2997 = vmatprep.subr.bf16.mxu0 %v4279_v10  ;;  %v4354_v51 = vld [vmem:[%s5367_s26 + $0x3e4] ss:$16 sps:$4 sm:$0xff]   ;;  %v4349_v10 = vld [vmem:[%s5367_s26 + $0x1e0] ss:$16 sps:$4 sm:$0xff]  }
 0x455   : > { %3038 = vmatprep.subr.bf16.mxu1 %v4282_v15  ;;  %v4352_v15 = vld [vmem:[%s5367_s26 + $0x3e0] ss:$16 sps:$4 sm:$0xff]  }
 0x457   : > { %2998 = vmatpush1.bf16.msra.mxu0 %v4277_v23  ;;  %v4357_v23 = vld [vmem:[%s5367_s26 + $0xc] ss:$16 sps:$4 sm:$0xff]  }
 0x458   : > { %3039 = vmatpush1.bf16.msra.mxu1 %v4280_v16  ;;  %2999 = vmatprep.subr.bf16.mxu0 %v4285_v17  ;;  %v4360_v16 = vld [vmem:[%s5367_s26 + $0x20c] ss:$16 sps:$4 sm:$0xff]   ;;  %v4355_v17 = vld [vmem:[%s5367_s26 + $0x8] ss:$16 sps:$4 sm:$0xff]  }
 0x459   : > { %3040 = vmatprep.subr.bf16.mxu1 %v4288_v18  ;;  %v5660_v18 = vpack.c.b16 %v5509_v52, %v5509_v52  ;;  %v4361_v52 = vld [vmem:[%s5367_s26 + $0x28] ss:$16 sps:$4 sm:$0xff]  }
 0x45b   : > { %3000 = vmatpush1.bf16.msra.mxu0 %v4283_v61  ;;  %v4358_v61 = vld [vmem:[%s5367_s26 + $0x208] ss:$16 sps:$4 sm:$0xff]  }
 0x45c   : > { %3041 = vmatpush1.bf16.msra.mxu1 %v4286_v19  ;;  %3001 = vmatprep.subr.bf16.mxu0 %v4291_v57  ;;  %v5665_v19 = vpack.c.b16 %v5514_v54, %v5514_v54  ;;  %v4363_v57 = vld [vmem:[%s5367_s26 + $0x2c] ss:$16 sps:$4 sm:$0xff]  }
 0x45d   : > { %3042 = vmatprep.subr.bf16.mxu1 %v4294_v11  ;;  %v4366_v11 = vld [vmem:[%s5367_s26 + $0x22c] ss:$16 sps:$4 sm:$0xff]  }
 0x45e   : > { %v4369_v54 = vld [vmem:[%s5367_s26 + $0x4c] ss:$16 sps:$4 sm:$0xff]  }
 0x45f   : > { %3002 = vmatpush1.bf16.msra.mxu0 %v4289_v20  ;;  %v4364_v20 = vld [vmem:[%s5367_s26 + $0x228] ss:$16 sps:$4 sm:$0xff]  }
 0x460   : > { %3043 = vmatpush1.bf16.msra.mxu1 %v4292_v21  ;;  %3003 = vmatprep.subr.bf16.mxu0 %v4297_v22  ;;  %v4372_v21 = vld [vmem:[%s5367_s26 + $0x24c] ss:$16 sps:$4 sm:$0xff]   ;;  %v4367_v22 = vld [vmem:[%s5367_s26 + $0x48] ss:$16 sps:$4 sm:$0xff]  }
 0x461   : > { %3044 = vmatprep.subr.bf16.mxu1 %v4300_v27  ;;  %v4370_v27 = vld [vmem:[%s5367_s26 + $0x248] ss:$16 sps:$4 sm:$0xff]  }
 0x463   : > { %3004 = vmatpush1.bf16.msra.mxu0 %v4295_v26  ;;  %v4378_v26 = vld [vmem:[%s5367_s26 + $0x26c] ss:$16 sps:$4 sm:$0xff]  }
 0x464   : > { %3045 = vmatpush1.bf16.msra.mxu1 %v4298_v62  ;;  %3005 = vmatprep.subr.bf16.mxu0 %v4303_v32  ;;  %v4376_v62 = vld [vmem:[%s5367_s26 + $0x268] ss:$16 sps:$4 sm:$0xff]   ;;  %v4381_v32 = vld [vmem:[%s5367_s26 + $0x8c] ss:$16 sps:$4 sm:$0xff]  }
 0x465   : > { %3046 = vmatprep.subr.bf16.mxu1 %v4306_v28  ;;  %v4384_v28 = vld [vmem:[%s5367_s26 + $0x28c] ss:$16 sps:$4 sm:$0xff]  }
 0x467   : > { %3006 = vmatpush1.bf16.msra.mxu0 %v4301_v29  ;;  %v4382_v29 = vld [vmem:[%s5367_s26 + $0x288] ss:$16 sps:$4 sm:$0xff]  }
 0x468   : > { %3047 = vmatpush1.bf16.msra.mxu1 %v4304_v34  ;;  %3007 = vmatprep.subr.bf16.mxu0 %v4309_v35  ;;  %v4387_v34 = vld [vmem:[%s5367_s26 + $0xac] ss:$16 sps:$4 sm:$0xff]  }
 0x469   : > { %3048 = vmatprep.subr.bf16.mxu1 %v4312_v36  ;;  %v4390_v35 = vld [vmem:[%s5367_s26 + $0x2ac] ss:$16 sps:$4 sm:$0xff]   ;;  %v4385_v36 = vld [vmem:[%s5367_s26 + $0xa8] ss:$16 sps:$4 sm:$0xff]  }
 0x46b   : > { %3008 = vmatpush1.bf16.msra.mxu0 %v4307_v39  ;;  %v4388_v39 = vld [vmem:[%s5367_s26 + $0x2a8] ss:$16 sps:$4 sm:$0xff]  }
 0x46c   : > { %3049 = vmatpush1.bf16.msra.mxu1 %v4310_v41  ;;  %3009 = vmatprep.subr.bf16.mxu0 %v4315_v33  ;;  %v4393_v41 = vld [vmem:[%s5367_s26 + $0xcc] ss:$16 sps:$4 sm:$0xff]  }
 0x46d   : > { %3050 = vmatprep.subr.bf16.mxu1 %v4318_v43  ;;  %v4396_v33 = vld [vmem:[%s5367_s26 + $0x2cc] ss:$16 sps:$4 sm:$0xff]   ;;  %v4391_v43 = vld [vmem:[%s5367_s26 + $0xc8] ss:$16 sps:$4 sm:$0xff]  }
 0x46f   : > { %3010 = vmatpush1.bf16.msra.mxu0 %v4313_v46  ;;  %v4394_v46 = vld [vmem:[%s5367_s26 + $0x2c8] ss:$16 sps:$4 sm:$0xff]  }
 0x470   : > { %3051 = vmatpush1.bf16.msra.mxu1 %v4316_v49  ;;  %3011 = vmatprep.subr.bf16.mxu0 %v4321_v53  ;;  %v4399_v49 = vld [vmem:[%s5367_s26 + $0xec] ss:$16 sps:$4 sm:$0xff]  }
 0x471   : > { %3052 = vmatprep.subr.bf16.mxu1 %v4324_v56  ;;  %v4402_v53 = vld [vmem:[%s5367_s26 + $0x2ec] ss:$16 sps:$4 sm:$0xff]   ;;  %v4397_v56 = vld [vmem:[%s5367_s26 + $0xe8] ss:$16 sps:$4 sm:$0xff]  }
 0x473   : > { %3012 = vmatpush1.bf16.msra.mxu0 %v4319_v0  ;;  %v4400_v0 = vld [vmem:[%s5367_s26 + $0x2e8] ss:$16 sps:$4 sm:$0xff]  }
 0x474   : > { %3053 = vmatpush1.bf16.msra.mxu1 %v4322_v1  ;;  %3013 = vmatprep.subr.bf16.mxu0 %v4327_v2  ;;  %v4405_v1 = vld [vmem:[%s5367_s26 + $0x10c] ss:$16 sps:$4 sm:$0xff]  }
 0x475   : > { %3054 = vmatprep.subr.bf16.mxu1 %v4330_v7  ;;  %v4408_v2 = vld [vmem:[%s5367_s26 + $0x30c] ss:$16 sps:$4 sm:$0xff]   ;;  %v4403_v7 = vld [vmem:[%s5367_s26 + $0x108] ss:$16 sps:$4 sm:$0xff]  }
 0x477   : > { %3014 = vmatpush1.bf16.msra.mxu0 %v4325_v3  ;;  %v4406_v3 = vld [vmem:[%s5367_s26 + $0x308] ss:$16 sps:$4 sm:$0xff]  }
 0x478   : > { %3055 = vmatpush1.bf16.msra.mxu1 %v4328_v4  ;;  %3015 = vmatprep.subr.bf16.mxu0 %v4333_v24  ;;  %v4411_v4 = vld [vmem:[%s5367_s26 + $0x12c] ss:$16 sps:$4 sm:$0xff]  }
 0x479   : > { %3056 = vmatprep.subr.bf16.mxu1 %v4336_v30  ;;  %v4414_v24 = vld [vmem:[%s5367_s26 + $0x32c] ss:$16 sps:$4 sm:$0xff]   ;;  %v4409_v30 = vld [vmem:[%s5367_s26 + $0x128] ss:$16 sps:$4 sm:$0xff]  }
 0x47b   : > { %3016 = vmatpush1.bf16.msra.mxu0 %v4331_v31  ;;  %v4412_v31 = vld [vmem:[%s5367_s26 + $0x328] ss:$16 sps:$4 sm:$0xff]  }
 0x47c   : > { %3057 = vmatpush1.bf16.msra.mxu1 %v4334_v25  ;;  %3017 = vmatprep.subr.bf16.mxu0 %v4339_v5  ;;  %v4417_v25 = vld [vmem:[%s5367_s26 + $0x14c] ss:$16 sps:$4 sm:$0xff]  }
 0x47d   : > { %3058 = vmatprep.subr.bf16.mxu1 %v4342_v6  ;;  %v4420_v5 = vld [vmem:[%s5367_s26 + $0x34c] ss:$16 sps:$4 sm:$0xff]   ;;  %v4415_v6 = vld [vmem:[%s5367_s26 + $0x148] ss:$16 sps:$4 sm:$0xff]  }
 0x47f   : > { %3018 = vmatpush1.bf16.msra.mxu0 %v4337_v55  ;;  %v4418_v55 = vld [vmem:[%s5367_s26 + $0x348] ss:$16 sps:$4 sm:$0xff]  }
 0x480   : > { %3059 = vmatpush1.bf16.msra.mxu1 %v4340_v8  ;;  %3019 = vmatprep.subr.bf16.mxu0 %v4345_v9  ;;  %v4423_v8 = vld [vmem:[%s5367_s26 + $0x16c] ss:$16 sps:$4 sm:$0xff]  }
 0x481   : > { %3060 = vmatprep.subr.bf16.mxu1 %v4348_v13  ;;  %v4426_v9 = vld [vmem:[%s5367_s26 + $0x36c] ss:$16 sps:$4 sm:$0xff]   ;;  %v4421_v13 = vld [vmem:[%s5367_s26 + $0x168] ss:$16 sps:$4 sm:$0xff]  }
 0x483   : > { %3020 = vmatpush1.bf16.msra.mxu0 %v4343_v12  ;;  %v4424_v12 = vld [vmem:[%s5367_s26 + $0x368] ss:$16 sps:$4 sm:$0xff]  }
 0x484   : > { %3061 = vmatpush1.bf16.msra.mxu1 %v4346_v50  ;;  %3021 = vmatprep.subr.bf16.mxu0 %v4351_v48  ;;  %v4429_v50 = vld [vmem:[%s5367_s26 + $0x18c] ss:$16 sps:$4 sm:$0xff]  }
 0x485   : > { %3062 = vmatprep.subr.bf16.mxu1 %v4354_v51  ;;  %v4432_v48 = vld [vmem:[%s5367_s26 + $0x38c] ss:$16 sps:$4 sm:$0xff]   ;;  %v4427_v51 = vld [vmem:[%s5367_s26 + $0x188] ss:$16 sps:$4 sm:$0xff]  }
 0x487   : > { %3022 = vmatpush1.bf16.msra.mxu0 %v4349_v10  ;;  %v4430_v10 = vld [vmem:[%s5367_s26 + $0x388] ss:$16 sps:$4 sm:$0xff]  }
 0x488   : > { %3063 = vmatpush1.bf16.msra.mxu1 %v4352_v15  ;;  %3073 = vmatprep.subr.bf16.mxu0 %v4357_v23  ;;  %v4435_v15 = vld [vmem:[%s5367_s26 + $0x1ac] ss:$16 sps:$4 sm:$0xff]  }
 0x489   : > { %3114 = vmatprep.subr.bf16.mxu1 %v4360_v16  ;;  %v4438_v23 = vld [vmem:[%s5367_s26 + $0x3ac] ss:$16 sps:$4 sm:$0xff]   ;;  %v4433_v16 = vld [vmem:[%s5367_s26 + $0x1a8] ss:$16 sps:$4 sm:$0xff]  }
 0x48a   : > { %3024 = vmatmul.mubr.bf16.vlgmr.msra.gmra.mrb[8].mxu0 %v5660_v18 }
 0x48b   : > { %3065 = vmatmul.mubr.bf16.vlgmr.msra.gmra.mrb[8].mxu1 %v5665_v19  ;;  %3074 = vmatpush1.bf16.msra.mxu0 %v4355_v17  ;;  %v4436_v17 = vld [vmem:[%s5367_s26 + $0x3a8] ss:$16 sps:$4 sm:$0xff]  }
 0x48c   : > { %3105 = vmatprep.mubr.bf16.mxu0 %v5583_v14  ;;  %3115 = vmatpush1.bf16.msra.mxu1 %v4358_v61  ;;  %v4375_v14 = vld [vmem:[%s5367_s26 + $0x6c] ss:$16 sps:$4 sm:$0xff]  }
 0x48d   : > { %3146 = vmatprep.mubr.bf16.mxu1 %v5589_v63  ;;  %3075 = vmatprep.subr.bf16.mxu0 %v4363_v57  ;;  %v4373_v63 = vld [vmem:[%s5367_s26 + $0x68] ss:$16 sps:$4 sm:$0xff]   ;;  %v4441_v61 = vld [vmem:[%s5367_s26 + $0x1cc] ss:$16 sps:$4 sm:$0xff]  }
 0x48e   : > { %3116 = vmatprep.subr.bf16.mxu1 %v4366_v11  ;;  %v4444_v57 = vld [vmem:[%s5367_s26 + $0x3cc] ss:$16 sps:$4 sm:$0xff]   ;;  %v4439_v11 = vld [vmem:[%s5367_s26 + $0x1c8] ss:$16 sps:$4 sm:$0xff]  }
 0x48f   : > { %3076 = vmatpush1.bf16.msra.mxu0 %v4361_v52  ;;  %v4442_v52 = vld [vmem:[%s5367_s26 + $0x3c8] ss:$16 sps:$4 sm:$0xff]  }
 0x490   : > { %3117 = vmatpush1.bf16.msra.mxu1 %v4364_v20  ;;  %3077 = vmatprep.subr.bf16.mxu0 %v4369_v54  ;;  %v4447_v20 = vld [vmem:[%s5367_s26 + $0x1ec] ss:$16 sps:$4 sm:$0xff]  }
 0x491   : > { %3118 = vmatprep.subr.bf16.mxu1 %v4372_v21  ;;  %v4450_v54 = vld [vmem:[%s5367_s26 + $0x3ec] ss:$16 sps:$4 sm:$0xff]   ;;  %v4445_v21 = vld [vmem:[%s5367_s26 + $0x1e8] ss:$16 sps:$4 sm:$0xff]  }
 0x493   : > { %3078 = vmatpush1.bf16.msra.mxu0 %v4367_v22  ;;  %v4448_v22 = vld [vmem:[%s5367_s26 + $0x3e8] ss:$16 sps:$4 sm:$0xff]  }
 0x494   : > { %3119 = vmatpush1.bf16.msra.mxu1 %v4370_v27  ;;  %3079 = vmatprep.subr.bf16.mxu0 %v4375_v14 }
 0x495   : > { %3120 = vmatprep.subr.bf16.mxu1 %v4378_v26 }
 0x497   : > { %3080 = vmatpush1.bf16.msra.mxu0 %v4373_v63 }
 0x498   : > { %3121 = vmatpush1.bf16.msra.mxu1 %v4376_v62  ;;  %3081 = vmatprep.subr.bf16.mxu0 %v4381_v32 }
 0x499   : > { %3122 = vmatprep.subr.bf16.mxu1 %v4384_v28 }
 0x49b   : > { %3082 = vmatpush1.bf16.msra.mxu0 %v4379_v44 }
 0x49c   : > { %3123 = vmatpush1.bf16.msra.mxu1 %v4382_v29  ;;  %3083 = vmatprep.subr.bf16.mxu0 %v4387_v34 }
 0x49d   : > { %3124 = vmatprep.subr.bf16.mxu1 %v4390_v35 }
 0x49f   : > { %3084 = vmatpush1.bf16.msra.mxu0 %v4385_v36 }
 0x4a0   : > { %3125 = vmatpush1.bf16.msra.mxu1 %v4388_v39  ;;  %3085 = vmatprep.subr.bf16.mxu0 %v4393_v41 }
 0x4a1   : > { %3126 = vmatprep.subr.bf16.mxu1 %v4396_v33 }
 0x4a3   : > { %3086 = vmatpush1.bf16.msra.mxu0 %v4391_v43 }
 0x4a4   : > { %3127 = vmatpush1.bf16.msra.mxu1 %v4394_v46  ;;  %3087 = vmatprep.subr.bf16.mxu0 %v4399_v49 }
 0x4a5   : > { %3128 = vmatprep.subr.bf16.mxu1 %v4402_v53 }
 0x4a7   : > { %3088 = vmatpush1.bf16.msra.mxu0 %v4397_v56 }
 0x4a8   : > { %3129 = vmatpush1.bf16.msra.mxu1 %v4400_v0  ;;  %3089 = vmatprep.subr.bf16.mxu0 %v4405_v1 }
 0x4a9   : > { %3130 = vmatprep.subr.bf16.mxu1 %v4408_v2 }
 0x4ab   : > { %3090 = vmatpush1.bf16.msra.mxu0 %v4403_v7 }
 0x4ac   : > { %3131 = vmatpush1.bf16.msra.mxu1 %v4406_v3  ;;  %3091 = vmatprep.subr.bf16.mxu0 %v4411_v4 }
 0x4ad   : > { %3132 = vmatprep.subr.bf16.mxu1 %v4414_v24 }
 0x4af   : > { %3092 = vmatpush1.bf16.msra.mxu0 %v4409_v30 }
 0x4b0   : > { %3133 = vmatpush1.bf16.msra.mxu1 %v4412_v31  ;;  %3093 = vmatprep.subr.bf16.mxu0 %v4417_v25 }
 0x4b1   : > { %3134 = vmatprep.subr.bf16.mxu1 %v4420_v5 }
 0x4b3   : > { %3094 = vmatpush1.bf16.msra.mxu0 %v4415_v6 }
 0x4b4   : > { %3135 = vmatpush1.bf16.msra.mxu1 %v4418_v55  ;;  %3095 = vmatprep.subr.bf16.mxu0 %v4423_v8  ;;  %v3163_v5 = vpop.permute.xlu0 %3162 }
 0x4b5   : > { %3136 = vmatprep.subr.bf16.mxu1 %v4426_v9 }
 0x4b7   : > { %3096 = vmatpush1.bf16.msra.mxu0 %v4421_v13 }
 0x4b8   : > { %3137 = vmatpush1.bf16.msra.mxu1 %v4424_v12  ;;  %3097 = vmatprep.subr.bf16.mxu0 %v4429_v50 }
 0x4b9   : > { %3138 = vmatprep.subr.bf16.mxu1 %v4432_v48 }
 0x4bb   : > { %3098 = vmatpush1.bf16.msra.mxu0 %v4427_v51 }
 0x4bc   : > { %3139 = vmatpush1.bf16.msra.mxu1 %v4430_v10  ;;  %3099 = vmatprep.subr.bf16.mxu0 %v4435_v15 }
 0x4bd   : > { %3140 = vmatprep.subr.bf16.mxu1 %v4438_v23 }
 0x4bf   : > { %3100 = vmatpush1.bf16.msra.mxu0 %v4433_v16 }
 0x4c0   : > { %3141 = vmatpush1.bf16.msra.mxu1 %v4436_v17  ;;  %3101 = vmatprep.subr.bf16.mxu0 %v4441_v61 }
 0x4c1   : > { %3142 = vmatprep.subr.bf16.mxu1 %v4444_v57 }
 0x4c3   : > { %3102 = vmatpush1.bf16.msra.mxu0 %v4439_v11 }
 0x4c4   : > { %3143 = vmatpush1.bf16.msra.mxu1 %v4442_v52  ;;  %3103 = vmatprep.subr.bf16.mxu0 %v4447_v20 }
 0x4c5   : > { %3144 = vmatprep.subr.bf16.mxu1 %v4450_v54 }
 0x4c7   : > { %3104 = vmatpush1.bf16.msra.mxu0 %v4445_v21 }
 0x4c8   : > { %3145 = vmatpush1.bf16.msra.mxu1 %v4448_v22 }
 0x4ca   : > { %3106 = vmatmul.mubr.bf16.vlgmr.msra.gmra.mrb[12].mxu0 %v5660_v18 }
 0x4cb   : > { %3147 = vmatmul.mubr.bf16.vlgmr.msra.gmra.mrb[12].mxu1 %v5665_v19 }
 0x4dd   : > { %v2205_v27 = vpop.f32.mrb[0].mxu0 }
 0x4de   : > { %v2246_v14 = vpop.f32.mrb[0].mxu1  ;;  %v2207_v26 = vpop.f32.mrb[1].mxu0 }
 0x4df   : > { %v2247_v63 = vadd.f32 %v2246_v14, %v2205_v27  ;;  %v2248_v62 = vpop.f32.mrb[1].mxu1  ;;  %v2209_v32 = vpop.f32.mrb[2].mxu0 }
 0x4e0   : > { %v2249_v28 = vadd.f32 %v2248_v62, %v2207_v26  ;;  %v2250_v44 = vpop.f32.mrb[2].mxu1  ;;  %v2210_v29 = vpop.f32.mrb[3].mxu0 }
 0x4e1   : > { %v2251_v34 = vpop.f32.mrb[3].mxu1 }
 0x51d   : > { %v2287_v35 = vpop.f32.mrb[4].mxu0 }
 0x51e   : > { %v2328_v36 = vpop.f32.mrb[4].mxu1  ;;  %v2289_v39 = vpop.f32.mrb[5].mxu0 }
 0x51f   : > { %v2329_v41 = vadd.f32 %v2328_v36, %v2287_v35  ;;  %v2330_v33 = vpop.f32.mrb[5].mxu1  ;;  %v2291_v43 = vpop.f32.mrb[6].mxu0 }
 0x520   : > { %v2331_v46 = vadd.f32 %v2330_v33, %v2289_v39  ;;  %v2332_v18 = vpop.f32.mrb[6].mxu1  ;;  %v2292_v49 = vpop.f32.mrb[7].mxu0 }
 0x521   : > { %v2333_v19 = vpop.f32.mrb[7].mxu1 }
 0x55d   : > { %v3025_v53 = vpop.f32.mrb[8].mxu0 }
 0x55e   : > { %v3026_v56 = vadd.f32 %v3025_v53, %v2247_v63  ;;  %v3066_v0 = vpop.f32.mrb[8].mxu1  ;;  %v3027_v1 = vpop.f32.mrb[9].mxu0 }
 0x55f   : > { %v3028_v2 = vadd.f32 %v3027_v1, %v2249_v28  ;;  %v3068_v7 = vpop.f32.mrb[9].mxu1  ;;  %v3029_v3 = vpop.f32.mrb[10].mxu0 }
 0x560   : > { %v3067_v4 = vadd.f32 %v3066_v0, %v3026_v56  ;;  %v3070_v24 = vpop.f32.mrb[10].mxu1  ;;  %v3030_v30 = vpop.f32.mrb[11].mxu0 }
 0x561   : > { %v3069_v31 = vadd.f32 %v3068_v7, %v3028_v2  ;;  %v3071_v25 = vpop.f32.mrb[11].mxu1 }
 0x562   : > { %v3165_v6 = vadd.f32 %v3163_v5, %v3067_v4 }
 0x563   : > { %v3166_v55 = vadd.f32 %v3163_v5, %v3069_v31 }
 0x564   : > { %v3169_v10 = vsel %vm1157_vm2, %v3165_v6, 0.0 }
 0x565   : > { %v3170_v15 = vsel %vm1157_vm2, %v3166_v55, 0.0 }
 0x566   : > { %v3171_v20 = vadd.f32 %v3170_v15, %v3169_v10 }
 0x59d   : > { %v3107_v8 = vpop.f32.mrb[12].mxu0 }
 0x59e   : > { %v3108_v9 = vadd.f32 %v3107_v8, %v2329_v41  ;;  %v3148_v13 = vpop.f32.mrb[12].mxu1  ;;  %v3109_v12 = vpop.f32.mrb[13].mxu0 }
 0x59f   : > { %v3110_v50 = vadd.f32 %v3109_v12, %v2331_v46  ;;  %v3150_v48 = vpop.f32.mrb[13].mxu1  ;;  %v3111_v51 = vpop.f32.mrb[14].mxu0  ;;  %v4754_v12 = vmov 1966171168  }
 0x5a0   : > { %v3149_v23 = vadd.f32 %v3148_v13, %v3108_v9  ;;  %v3152_v16 = vpop.f32.mrb[14].mxu1  ;;  %v3112_v17 = vpop.f32.mrb[15].mxu0 }
 0x5a1   : > { %v3151_v61 = vadd.f32 %v3150_v48, %v3110_v50  ;;  %v3153_v57 = vpop.f32.mrb[15].mxu1  ;;  %v3234_v50 = vunpack.c.l.s4 %v4754_v12 }
 0x5a2   : > { %v3167_v11 = vadd.f32 %v3163_v5, %v3149_v23 }
 0x5a3   : > { %v3168_v52 = vadd.f32 %v3163_v5, %v3151_v61  ;;  %v3235_v48 = vunpack.c.0.s8 %v3234_v50 }
 0x5a4   : > { %v3172_v54 = vsel %vm1157_vm2, %v3167_v11, 0.0 }
 0x5a5   : > { %v3173_v21 = vadd.f32 %v3172_v54, %v3171_v20  ;;  %v3174_v22 = vsel %vm1157_vm2, %v3168_v52, 0.0  ;;  %v3238_v10 = vsub.s32 %v3235_v48, %v5136_v37 }
 0x5a7   : > { %v3175_v27 = vadd.f32 %v3174_v22, %v3173_v21 }
 0x5a9   : > { %3176 = vadd.xlane.f32.xlu1 %v3175_v27 }
 0x636   : > { %v3177_v14 = vpop.xlane.xlu1 %3176 }
 0x637   : > { %v3178_v26 = vmul.f32 0.001953125, %v3177_v14 }
 0x639   : > { %v3179_v63 = vsub.f32 %v3165_v6, %v3178_v26  ;;  %v3180_v62 = vsub.f32 %v3166_v55, %v3178_v26  ;;  %v3181_v32 = vsub.f32 %v3167_v11, %v3178_v26  ;;  %v3182_v28 = vsub.f32 %v3168_v52, %v3178_v26 }
 0x63b   : > { %v3183_v44 = vmul.f32 %v3179_v63, %v3179_v63  ;;  %v3184_v29 = vmul.f32 %v3180_v62, %v3180_v62  ;;  %v3185_v34 = vmul.f32 %v3181_v32, %v3181_v32  ;;  %v3186_v35 = vmul.f32 %v3182_v28, %v3182_v28 }
 0x63d   : > { %v3187_v36 = vsel %vm1157_vm2, %v3183_v44, 0.0  ;;  %v3188_v39 = vsel %vm1157_vm2, %v3184_v29, 0.0  ;;  %v3190_v33 = vsel %vm1157_vm2, %v3185_v34, 0.0  ;;  %v3192_v46 = vsel %vm1157_vm2, %v3186_v35, 0.0 }
 0x63e   : > { %v3189_v41 = vadd.f32 %v3188_v39, %v3187_v36  ;;  %v4496_v39 = vld [vmem:[%s5067_s27 + $0x8] sm:$0xff] }
 0x640   : > { %v3191_v43 = vadd.f32 %v3190_v33, %v3189_v41 }
 0x642   : > { %v3193_v18 = vadd.f32 %v3192_v46, %v3191_v43 }
 0x644   : > { %3194 = vadd.xlane.f32.xlu1 %v3193_v18 }
 0x6d1   : > { %v3195_v49 = vpop.xlane.xlu1 %3194 }
 0x6d2   : > { %v3196_v19 = vmul.f32 0.001953125, %v3195_v49 }
 0x6d4   : > { %v3197_v53 = vadd.f32 1e-05, %v3196_v19 }
 0x6d6   : > { %4477 = vrsqrt.f32 %v3197_v53 }
 0x6e0   : > { %v4478_v56 = vpop.eup %4477 }
 0x6e1   : > { %v3199_v0 = vmul.f32 %v4478_v56, %v3179_v63  ;;  %v3200_v1 = vmul.f32 %v4478_v56, %v3180_v62  ;;  %v3201_v2 = vmul.f32 %v4478_v56, %v3181_v32  ;;  %v3202_v7 = vmul.f32 %v4478_v56, %v3182_v28 }
 0x6e3   : > { %v3951_v3 = vmul.f32 -1.442695, %v3199_v0  ;;  %v3952_v4 = vmul.f32 -1.442695, %v3200_v1  ;;  %v3953_v24 = vmul.f32 -1.442695, %v3201_v2 }
 0x6e4   : > { %v3954_v30 = vmul.f32 -1.442695, %v3202_v7 }
 0x6e5   : > { %4479 = vpow2.f32 %v3951_v3 }
 0x6e6   : > { %4481 = vpow2.f32 %v3952_v4 }
 0x6e7   : > { %4483 = vpow2.f32 %v3953_v24 }
 0x6e8   : > { %4485 = vpow2.f32 %v3954_v30 }
 0x6ef   : > { %v4480_v31 = vpop.eup %4479 }
 0x6f0   : > { %v4482_v25 = vpop.eup %4481  ;;  %v3215_v5 = vadd.f32 1.0, %v4480_v31 }
 0x6f1   : > { %v4484_v6 = vpop.eup %4483  ;;  %v3216_v55 = vadd.f32 1.0, %v4482_v25 }
 0x6f2   : > { %v4486_v8 = vpop.eup %4485  ;;  %v3217_v9 = vadd.f32 1.0, %v4484_v6  ;;  %4487 = vrcp.f32 %v3215_v5 }
 0x6f3   : > { %v3218_v13 = vadd.f32 1.0, %v4486_v8  ;;  %4489 = vrcp.f32 %v3216_v55 }
 0x6f4   : > { %4491 = vrcp.f32 %v3217_v9 }
 0x6f5   : > { %4493 = vrcp.f32 %v3218_v13 }
 0x6fc   : > { %v4488_v51 = vpop.eup %4487 }
 0x6fd   : > { %v4490_v15 = vpop.eup %4489 }
 0x6fe   : > { %v4492_v23 = vpop.eup %4491  ;;  %v3231_v16 = vcombine.low %v4488_v51, %v4490_v15 }
 0x6ff   : > { %v4494_v17 = vpop.eup %4493 }
 0x700   : > { %v3232_v61 = vcombine.low %v4492_v23, %v4494_v17  ;;  %v3239_v57 = vrot.slane %v3231_v16, %v3238_v10 }
 0x702   : > { %v3246_v11 = vrot.slane %v3232_v61, %v3238_v10 }
 0x704   : > { %v3247_v52 = vcombine.low %v3239_v57, %v3246_v11  ;;  %v3248_v20 = vcombine.high %v3239_v57, %v3246_v11 }
 0x706   : > { %v3255_v54 = vrot.slane %v3247_v52, %v3238_v10  ;;  %v3262_v21 = vrot.slane %v3248_v20, %v3238_v10 }
 0x708   : > { %v3266_v22 = vrot.slane %v3255_v54, %v5145_v40  ;;  %v3270_v27 = vrot.slane %v3255_v54, %v5142_v38  ;;  %v3274_v14 = vrot.slane %v3255_v54, %v5149_v42  ;;  %v3278_v37 = vrot.slane %v3255_v54, %v5154_v45 }
 0x709   : > { %v3282_v26 = vrot.slane %v3262_v21, %v5145_v40  ;;  %v3286_v63 = vrot.slane %v3262_v21, %v5142_v38  ;;  %v3290_v62 = vrot.slane %v3262_v21, %v5149_v42  ;;  %v3294_v32 = vrot.slane %v3262_v21, %v5154_v45  ;;  %v4495_v45 = vld [vmem:[%s5067_s27] sm:$0xff] }
 0x70a   : > { %v3295_v28 = vcombine.low %v3266_v22, %v3270_v27  ;;  %v3296_v44 = vcombine.low %v3274_v14, %v3278_v37 }
 0x70b   : > { %v3297_v29 = vcombine.low %v3282_v26, %v3286_v63  ;;  %v3298_v34 = vcombine.low %v3290_v62, %v3294_v32 }
 0x70c   : > { %v3303_v40 = vmul.f32 %v3295_v28, %v5195_v59  ;;  %v3304_v35 = vmul.f32 %v3296_v44, %v5198_v60  ;;  %v4497_v59 = vld [vmem:[%s5067_s27 + $0x10] sm:$0xff] }
 0x70d   : > { %v3305_v38 = vmul.f32 %v3297_v29, %v5189_v47  ;;  %v3306_v42 = vmul.f32 %v3298_v34, %v5192_v58  ;;  %v4498_v47 = vld [vmem:[%s5067_s27 + $0x18] sm:$0xff] }
 0x70e   : > { %v3307_v36 = vadd.f32 %v4495_v45, %v3303_v40  ;;  %v3308_v41 = vadd.f32 %v4496_v39, %v3304_v35 }
 0x70f   : > { %v3309_v60 = vadd.f32 %v4497_v59, %v3305_v38  ;;  %v3310_v33 = vadd.f32 %v4498_v47, %v3306_v42 }
 0x710   : > { %3311 = vst [vmem:[%s556_s6] sm:$0xff] %v3307_v36  ;;  %3312 = vst [vmem:[%s556_s6 + $0x8] sm:$0xff] %v3308_v41 }
 0x711   : > { %3313 = vst [vmem:[%s556_s6 + $0x10] sm:$0xff] %v3309_v60  ;;  %3314 = vst [vmem:[%s556_s6 + $0x18] sm:$0xff] %v3310_v33 }
 0x712   : > { %4662 = shalt.err (!%p4659_p13)
}
 0x713   : > { %s4663_s27 = scalar_lea.hbm %s5760_s9, 512  ;;  %s4667_s20 = scalar_lea.hbm %s5872_s29, 1024 }
 0x714   : > { %p4664_p6 = scmp.ne.s32.totalorder %s5760_s9, %s4663_s27  ;;  %p4668_p2 = scmp.lt.u32.totalorder %s5760_s9, %s5872_s29 }
 0x715   : > { %p4669_p8 = scmp.lt.u32.totalorder %s4667_s20, %s4663_s27  ;;  %p4671_p0 = scmp.lt.u32.totalorder %s4663_s27, %s5760_s9 }
 0x716   : > { %p4665_p9 = pnand %p4664_p6, %p5874_p7 }
 0x717   : > { %p4670_p12 = por %p4669_p8, %p4668_p2 }
 0x718   : > { %p4666_p10 = pneg %p4665_p9 }
 0x719   : > { %p4672_p1 = por %p4671_p0, %p4670_p12 }
 0x71b   : > { %p4673_p3 = pnand %p4672_p1, %p4666_p10 }
 0x71d   : > { %4676 = shalt.err (!%p4673_p3)
}
 0x71e   : > { %s4756_s0 = smov 256   ;;  %s4757_s26 = smov 512  }
 0x71f   : > { %s4758_s16 = smov 16  }
 0x720   : > { %3973 = dma.vmem_to_hbm [thread:$0]  (%p5874_p7), %s5764_s15, 512, %s5760_s9, %s3316_s17, %s4756_s0, %s4757_s26, %s4758_s16  }
 0x721 PF: > { %s5875_s11 = sld [smem:[#allocation16_spill]]  ;;  %s5876_s22 = sld [smem:[#allocation22_spill]] }
 0x722   : > { %s5877_s2 = sld [smem:[#allocation18_spill]] }
 0x727   : > { %s3347_s5 = sand.u32 1, %s5875_s11   ;;  %p5878_p11 = scmp.ne.s32.totalorder %s5876_s22, 0 }
 0x728   : > { %p5879_p5 = scmp.ge.s32.totalorder %s5877_s2, 2  ;;  %s3348_s6 = scalar_lea.sflag [#allocation4], %s3347_s5 }
 0x72a   : > { %p3992_p4 = pnand %p5879_p5, %p5878_p11 }
 0x72c   : > { %4714 = dma.done.wait (!%p3992_p4), %s3348_s6, 512  }
 0x72d   : > { %4716 = vsyncadd (!%p3992_p4), %s3348_s6, 4294966784  ;;  %s31_s14 = sadd.s32 1, %s5877_s2   ;;  %s5880_s21 = sld [smem:[#allocation17_spill]] }
 0x72e   : > { %p28_p13 = scmp.ge.s32.totalorder %s31_s14, 4   ;;  %s5881_s11 = sld [smem:[#allocation21_spill]] }
 0x72f   : > { %s5882_s18 = sld [smem:[#allocation19_spill]]  ;;  %s5883_s30 = smov %s4723_s10 }
 0x730   : > { %s5885_s12 = smov %s4735_s13  ;;  %30 = sbr.rel (!%p28_p13) target bundleno = 18 (0x12), region = 162 }
 0x733   : > { %s5884_s10 = smov %s5880_s21 }
 0x735   : > { %s5886_s13 = smov %s5882_s18 }
 0x737   :  { %3353 = vsyncpa [#allocation3], 1 }
 0x738   :  { %3355 = vsyncpa [#allocation3 + $0x1], 1 }
 0x739   :  { %3356 = vsyncpa [#allocation6], 1 }
 0x73a   :  { %3358 = vsyncpa [#allocation6 + $0x1], 1 }
 0x73b   :  { %3359 = vsyncpa [#allocation9], 1 }
 0x73c   :  { %3361 = vsyncpa [#allocation9 + $0x1], 1 }
 0x73d   :  { %3362 = vsyncpa [#allocation4], 1 }
 0x73e   :  { %3364 = vsyncpa [#allocation4 + $0x1], 1 }

</bundles_post_ra>
